<compile_context>
chip_gen: v5e
topology: v5e:2x2
jax: 0.10.0
libtpu: 0.0.40
codegen_flags: <defaults>
</compile_context>

<pallas_src>
import jax
import jax.numpy as jnp
import numpy as np
from jax.experimental import pallas as pl
from jax.experimental.pallas import tpu as pltpu


def _attnpool_kernel(x_ref, pe0_ref, pesp_ref, wqkv_ref, bqkv_ref,
                     wkv_ref, bkv_ref, wc_ref, bc_ref, hsum_ref, hexp_ref,
                     o_ref):
    B, HW, C = x_ref.shape                              # batch tile of tokens

    xt = x_ref[...]                                     # (B, HW, C)

    # CLS token = spatial mean, plus positional-embedding row 0.
    cls = jnp.mean(xt, axis=1) + pe0_ref[...]           # (B, C)
    # Spatial tokens plus positional-embedding rows 1..HW.
    xsp = xt + pesp_ref[...][None, :, :]                # (B, HW, C)

    # --- fused projections (scale already folded into the q part) ---
    qkv_cls = (jnp.dot(cls, wqkv_ref[...],
                       preferred_element_type=jnp.float32)
               + bqkv_ref[...])                         # (B, 3C)
    q = qkv_cls[:, :C]                                  # (B, C)   scaled query
    k_cls = qkv_cls[:, C:2 * C]                         # (B, C)
    v_cls = qkv_cls[:, 2 * C:]                          # (B, C)

    kv_sp = (jnp.dot(xsp.reshape(B * HW, C), wkv_ref[...],
                     preferred_element_type=jnp.float32)
             + bkv_ref[...])                            # (B*HW, 2C)
    k_sp = kv_sp[:, :C].reshape(B, HW, C)               # (B, HW, C)
    v_sp = kv_sp[:, C:].reshape(B, HW, C)               # (B, HW, C)

    # --- per-head scores, vectorized over batch and heads ---
    # score[b, s, h] = sum_{c in head h} q[b, c] * k[b, s, c]
    # implemented as elementwise mul (VPU) + one head-sum matmul (MXU).
    s_cls = jnp.dot(q * k_cls, hsum_ref[...],
                    preferred_element_type=jnp.float32)               # (B, H)
    s_sp = jnp.dot((k_sp * q[:, None, :]).reshape(B * HW, C),
                   hsum_ref[...],
                   preferred_element_type=jnp.float32)                # (B*HW, H)
    s_sp = s_sp.reshape(B, HW, -1)                                    # (B, HW, H)

    # --- single softmax over the L = HW+1 keys (CLS handled separately) ---
    m = jnp.maximum(s_cls, jnp.max(s_sp, axis=1))                     # (B, H)
    p_cls = jnp.exp(s_cls - m)                                        # (B, H)
    p_sp = jnp.exp(s_sp - m[:, None, :])                              # (B, HW, H)
    denom = p_cls + jnp.sum(p_sp, axis=1)                             # (B, H)
    inv = pl.reciprocal(denom, approx=True)                           # EUP slot
    pn_cls = p_cls * inv
    pn_sp = p_sp * inv[:, None, :]

    # --- expand per-head probs to per-channel and weight the values ---
    pf_cls = jnp.dot(pn_cls, hexp_ref[...],
                     preferred_element_type=jnp.float32)              # (B, C)
    pf_sp = jnp.dot(pn_sp.reshape(B * HW, -1), hexp_ref[...],
                    preferred_element_type=jnp.float32).reshape(B, HW, C)
    attn = pf_cls * v_cls + jnp.sum(pf_sp * v_sp, axis=1)             # (B, C)

    # --- output projection ---
    o_ref[...] = (jnp.dot(attn, wc_ref[...],
                          preferred_element_type=jnp.float32)
                  + bc_ref[...]).astype(o_ref.dtype)


def _pick_b_tile(n):
    # Sublane-aligned tile of 8 when the batch allows it; otherwise keep at
    # least 2 grid steps so the batch axis can shard across v7x's 2 TCs.
    if n >= 16:
        return 8
    return max(1, n // 2) if n >= 2 else 1


def attention_pool_2d_curve(x_nchw, coeffs_t, params, num_heads, b_tile=None):
    N, C, H, W = x_nchw.shape
    HW = H * W
    D = C // num_heads

    # --- curve-point mixing (parameter setup; plain JAX glue) ---
    mix = lambda p: jnp.einsum('b,b...->...', coeffs_t, p)
    pe = mix(params['pe'])                               # (HW+1, C)
    wq, bq = mix(params['wq']), mix(params['bq'])        # (C, C), (C,)
    wk, bk = mix(params['wk']), mix(params['bk'])
    wv, bv = mix(params['wv']), mix(params['bv'])
    wc, bc = mix(params['wc']), mix(params['bc'])        # (Cout, C), (Cout,)
    Cout = wc.shape[0]

    # Fold 1/sqrt(D) into the query projection (one-time transform).
    scale = 1.0 / (D ** 0.5)
    wq_s, bq_s = wq * scale, bq * scale

    # Fused, pre-transposed projection weights.
    w_qkv = jnp.concatenate([wq_s.T, wk.T, wv.T], axis=1)          # (C, 3C)
    b_qkv = jnp.concatenate([bq_s, bk, bv]).reshape(1, 3 * C)
    w_kv = jnp.concatenate([wk.T, wv.T], axis=1)                   # (C, 2C)
    b_kv = jnp.concatenate([bk, bv]).reshape(1, 2 * C)
    wc_t = wc.T                                                    # (C, Cout)
    bc2 = bc.reshape(1, Cout)

    pe0 = pe[0:1]                                                  # (1, C)
    pe_sp = pe[1:]                                                 # (HW, C)

    # Head-sum / head-expand matrices (encode the head structure as matmuls).
    head_ids = jnp.arange(C) // D
    hsum = (head_ids[:, None] == jnp.arange(num_heads)[None, :]
            ).astype(jnp.float32)                                  # (C, H)
    hexp = hsum.T                                                  # (H, C)

    # NCHW -> (N, HW, C) tokens.
    x_tok = jnp.transpose(x_nchw.reshape(N, C, HW), (0, 2, 1))

    if b_tile is None:
        b_tile = _pick_b_tile(N)
    n_pad = pl.cdiv(N, b_tile) * b_tile
    if n_pad != N:
        x_tok = jnp.pad(x_tok, ((0, n_pad - N), (0, 0), (0, 0)))

    out = pl.pallas_call(
        _attnpool_kernel,
        out_shape=jax.ShapeDtypeStruct((n_pad, Cout), x_nchw.dtype),
        grid=(n_pad // b_tile,),
        in_specs=[
            pl.BlockSpec((b_tile, HW, C), lambda b: (b, 0, 0)),    # x tokens
            pl.BlockSpec((1, C), lambda b: (0, 0)),                # pe row 0
            pl.BlockSpec((HW, C), lambda b: (0, 0)),               # pe rows 1:
            pl.BlockSpec((C, 3 * C), lambda b: (0, 0)),            # W_qkv^T
            pl.BlockSpec((1, 3 * C), lambda b: (0, 0)),            # b_qkv
            pl.BlockSpec((C, 2 * C), lambda b: (0, 0)),            # W_kv^T
            pl.BlockSpec((1, 2 * C), lambda b: (0, 0)),            # b_kv
            pl.BlockSpec((C, Cout), lambda b: (0, 0)),             # Wc^T
            pl.BlockSpec((1, Cout), lambda b: (0, 0)),             # bc
            pl.BlockSpec((C, num_heads), lambda b: (0, 0)),        # head-sum
            pl.BlockSpec((num_heads, C), lambda b: (0, 0)),        # head-expand
        ],
        out_specs=pl.BlockSpec((b_tile, Cout), lambda b: (b, 0)),
        compiler_params=pltpu.CompilerParams(
            dimension_semantics=("parallel",)),
    )(x_tok, pe0, pe_sp, w_qkv, b_qkv, w_kv, b_kv, wc_t, bc2, hsum, hexp)
    return out[:N]


def reference(x_nchw, coeffs_t, params, num_heads):
    """Pure-JAX replica of the PyTorch forward for validation."""
    N, C, H, W = x_nchw.shape
    HW = H * W
    L = HW + 1
    D = C // num_heads

    mix = lambda p: jnp.einsum('b,b...->...', coeffs_t, p)
    pe = mix(params['pe'])
    wq, bq = mix(params['wq']), mix(params['bq'])
    wk, bk = mix(params['wk']), mix(params['bk'])
    wv, bv = mix(params['wv']), mix(params['bv'])
    wc, bc = mix(params['wc']), mix(params['bc'])

    x = jnp.transpose(x_nchw.reshape(N, C, HW), (2, 0, 1))           # (HW, N, C)
    x = jnp.concatenate([x.mean(axis=0, keepdims=True), x], axis=0)  # (L, N, C)
    x = x + pe[:, None, :]

    scale = 1.0 / (D ** 0.5)
    q = (x @ wq.T + bq) * scale
    k = x @ wk.T + bk
    v = x @ wv.T + bv
    qh = q.reshape(L, N, num_heads, D)
    kh = k.reshape(L, N, num_heads, D)
    vh = v.reshape(L, N, num_heads, D)
    scores = jnp.einsum('qnhd,knhd->nhqk', qh, kh)
    attn = jax.nn.softmax(scores, axis=-1)
    out = jnp.einsum('nhqk,knhd->qnhd', attn, vh).reshape(L, N, C)
    out = out @ wc.T + bc
    return out[0]                                                    # (N, Cout)


if __name__ == "__main__":
    # Small shapes consistent with the module; batch=16 exercises the
    # batch-tiled path (b_tile=8, grid=2).
    batch = 16
    embed_dim = 32       # C (== input channels)
    spacial_dim = 4      # H = W
    num_heads = 4
    output_dim = 64
    num_bends = 3        # curve with 3 control points

    HW = spacial_dim * spacial_dim
    L = HW + 1

    key = jax.random.PRNGKey(0)
    ks = jax.random.split(key, 11)

    params = {
        'pe': jax.random.normal(ks[0], (num_bends, L, embed_dim),
                                jnp.float32) / (embed_dim ** 0.5),
        'wq': 0.05 * jax.random.normal(ks[1], (num_bends, embed_dim, embed_dim), jnp.float32),
        'bq': 0.05 * jax.random.normal(ks[2], (num_bends, embed_dim), jnp.float32),
        'wk': 0.05 * jax.random.normal(ks[3], (num_bends, embed_dim, embed_dim), jnp.float32),
        'bk': 0.05 * jax.random.normal(ks[4], (num_bends, embed_dim), jnp.float32),
        'wv': 0.05 * jax.random.normal(ks[5], (num_bends, embed_dim, embed_dim), jnp.float32),
        'bv': 0.05 * jax.random.normal(ks[6], (num_bends, embed_dim), jnp.float32),
        'wc': 0.05 * jax.random.normal(ks[7], (num_bends, output_dim, embed_dim), jnp.float32),
        'bc': 0.05 * jax.random.normal(ks[8], (num_bends, output_dim), jnp.float32),
    }

    x = jax.random.normal(ks[9], (batch, embed_dim, spacial_dim, spacial_dim),
                          jnp.float32)

    # Bezier coefficients at t = 0.3 (deterministic curve point).
    t = 0.3
    coeffs_t = jnp.array([(1 - t) ** 2, 2 * t * (1 - t), t ** 2], jnp.float32)

    out = attention_pool_2d_curve(x, coeffs_t, params, num_heads)
    out = jax.block_until_ready(out)

    ref = jax.block_until_ready(reference(x, coeffs_t, params, num_heads))

    assert out.shape == (batch, output_dim), out.shape
    # Tolerance loosened slightly vs. exact-divide version because the softmax
    # normalization uses the EUP approximate reciprocal.
    np.testing.assert_allclose(np.asarray(out), np.asarray(ref),
                               rtol=2e-3, atol=2e-3)
    print("KERNEL_OK")
</pallas_src>

<mosaic_0001>
module attributes {stable_mosaic.version = 11 : i64} {
  func.func @_attnpool_kernel(%arg0: i32, %arg1: memref<8x16x32xf32, #tpu.memory_space<vmem>>, %arg2: memref<1x32xf32, #tpu.memory_space<vmem>>, %arg3: memref<16x32xf32, #tpu.memory_space<vmem>>, %arg4: memref<32x96xf32, #tpu.memory_space<vmem>>, %arg5: memref<1x96xf32, #tpu.memory_space<vmem>>, %arg6: memref<32x64xf32, #tpu.memory_space<vmem>>, %arg7: memref<1x64xf32, #tpu.memory_space<vmem>>, %arg8: memref<32x64xf32, #tpu.memory_space<vmem>>, %arg9: memref<1x64xf32, #tpu.memory_space<vmem>>, %arg10: memref<32x4xf32, #tpu.memory_space<vmem>>, %arg11: memref<4x32xf32, #tpu.memory_space<vmem>>, %arg12: memref<8x64xf32, #tpu.memory_space<vmem>>) attributes {dimension_semantics = [#tpu.dimension_semantics<parallel>], iteration_bounds = array<i64: 2>, scalar_prefetch = 0 : i64, scratch_operands = 0 : i64, tpu.core_type = #tpu.core_type<tc>, window_params = [{transform_indices = @transform_0, window_bounds = array<i64: 8, 16, 32>}, {pipeline_mode = #tpu.pipeline_mode<synchronous>, transform_indices = @transform_1, window_bounds = array<i64: 1, 32>}, {pipeline_mode = #tpu.pipeline_mode<synchronous>, transform_indices = @transform_2, window_bounds = array<i64: 16, 32>}, {pipeline_mode = #tpu.pipeline_mode<synchronous>, transform_indices = @transform_3, window_bounds = array<i64: 32, 96>}, {pipeline_mode = #tpu.pipeline_mode<synchronous>, transform_indices = @transform_4, window_bounds = array<i64: 1, 96>}, {pipeline_mode = #tpu.pipeline_mode<synchronous>, transform_indices = @transform_5, window_bounds = array<i64: 32, 64>}, {pipeline_mode = #tpu.pipeline_mode<synchronous>, transform_indices = @transform_6, window_bounds = array<i64: 1, 64>}, {pipeline_mode = #tpu.pipeline_mode<synchronous>, transform_indices = @transform_7, window_bounds = array<i64: 32, 64>}, {pipeline_mode = #tpu.pipeline_mode<synchronous>, transform_indices = @transform_8, window_bounds = array<i64: 1, 64>}, {pipeline_mode = #tpu.pipeline_mode<synchronous>, transform_indices = @transform_9, window_bounds = array<i64: 32, 4>}, {pipeline_mode = #tpu.pipeline_mode<synchronous>, transform_indices = @transform_10, window_bounds = array<i64: 4, 32>}, {transform_indices = @transform_11, window_bounds = array<i64: 8, 64>}]} {
    %c0 = arith.constant 0 : index
    %c0_0 = arith.constant 0 : index
    %c0_1 = arith.constant 0 : index
    %0 = vector.load %arg1[%c0, %c0_0, %c0_1] : memref<8x16x32xf32, #tpu.memory_space<vmem>>, vector<8x16x32xf32>
    %cst = arith.constant dense<0.000000e+00> : vector<8x32xf32>
    %1 = vector.multi_reduction <add>, %0, %cst [1] : vector<8x16x32xf32> to vector<8x32xf32>
    %cst_2 = arith.constant 1.600000e+01 : f32
    %2 = vector.broadcast %cst_2 : f32 to vector<8x32xf32>
    %3 = arith.divf %1, %2 : vector<8x32xf32>
    %c0_3 = arith.constant 0 : index
    %c0_4 = arith.constant 0 : index
    %4 = vector.load %arg2[%c0_3, %c0_4] : memref<1x32xf32, #tpu.memory_space<vmem>>, vector<1x32xf32>
    %5 = vector.broadcast %4 : vector<1x32xf32> to vector<8x32xf32>
    %6 = arith.addf %3, %5 : vector<8x32xf32>
    %c0_5 = arith.constant 0 : index
    %c0_6 = arith.constant 0 : index
    %7 = vector.load %arg3[%c0_5, %c0_6] : memref<16x32xf32, #tpu.memory_space<vmem>>, vector<16x32xf32>
    %8 = vector.shape_cast %7 : vector<16x32xf32> to vector<1x16x32xf32>
    %9 = vector.broadcast %8 : vector<1x16x32xf32> to vector<8x16x32xf32>
    %10 = arith.addf %0, %9 : vector<8x16x32xf32>
    %c0_7 = arith.constant 0 : index
    %c0_8 = arith.constant 0 : index
    %11 = vector.load %arg4[%c0_7, %c0_8] : memref<32x96xf32, #tpu.memory_space<vmem>>, vector<32x96xf32>
    %cst_9 = arith.constant dense<0.000000e+00> : vector<8x96xf32>
    %12 = tpu.matmul %6, %11, %cst_9 {dimension_numbers = #tpu.dot_dimension_numbers<[1], [0], [0], [1], [0, 0, 1, 1], [], []>} : vector<8x32xf32>, vector<32x96xf32>, vector<8x96xf32> -> vector<8x96xf32>
    %c0_10 = arith.constant 0 : index
    %c0_11 = arith.constant 0 : index
    %13 = vector.load %arg5[%c0_10, %c0_11] : memref<1x96xf32, #tpu.memory_space<vmem>>, vector<1x96xf32>
    %14 = vector.broadcast %13 : vector<1x96xf32> to vector<8x96xf32>
    %15 = arith.addf %12, %14 : vector<8x96xf32>
    %16 = vector.extract_strided_slice %15 {offsets = [0, 0], sizes = [8, 32], strides = [1, 1]} : vector<8x96xf32> to vector<8x32xf32>
    %17 = vector.extract_strided_slice %15 {offsets = [0, 32], sizes = [8, 32], strides = [1, 1]} : vector<8x96xf32> to vector<8x32xf32>
    %18 = vector.extract_strided_slice %15 {offsets = [0, 64], sizes = [8, 32], strides = [1, 1]} : vector<8x96xf32> to vector<8x32xf32>
    %19 = vector.shape_cast %10 : vector<8x16x32xf32> to vector<128x32xf32>
    %c0_12 = arith.constant 0 : index
    %c0_13 = arith.constant 0 : index
    %20 = vector.load %arg6[%c0_12, %c0_13] : memref<32x64xf32, #tpu.memory_space<vmem>>, vector<32x64xf32>
    %cst_14 = arith.constant dense<0.000000e+00> : vector<128x64xf32>
    %21 = tpu.matmul %19, %20, %cst_14 {dimension_numbers = #tpu.dot_dimension_numbers<[1], [0], [0], [1], [0, 0, 1, 1], [], []>} : vector<128x32xf32>, vector<32x64xf32>, vector<128x64xf32> -> vector<128x64xf32>
    %c0_15 = arith.constant 0 : index
    %c0_16 = arith.constant 0 : index
    %22 = vector.load %arg7[%c0_15, %c0_16] : memref<1x64xf32, #tpu.memory_space<vmem>>, vector<1x64xf32>
    %23 = vector.broadcast %22 : vector<1x64xf32> to vector<128x64xf32>
    %24 = arith.addf %21, %23 : vector<128x64xf32>
    %25 = vector.extract_strided_slice %24 {offsets = [0, 0], sizes = [128, 32], strides = [1, 1]} : vector<128x64xf32> to vector<128x32xf32>
    %26 = vector.shape_cast %25 : vector<128x32xf32> to vector<8x16x32xf32>
    %27 = vector.extract_strided_slice %24 {offsets = [0, 32], sizes = [128, 32], strides = [1, 1]} : vector<128x64xf32> to vector<128x32xf32>
    %28 = vector.shape_cast %27 : vector<128x32xf32> to vector<8x16x32xf32>
    %29 = arith.mulf %16, %17 : vector<8x32xf32>
    %c0_17 = arith.constant 0 : index
    %c0_18 = arith.constant 0 : index
    %30 = vector.load %arg10[%c0_17, %c0_18] : memref<32x4xf32, #tpu.memory_space<vmem>>, vector<32x4xf32>
    %cst_19 = arith.constant dense<0.000000e+00> : vector<8x4xf32>
    %31 = tpu.matmul %29, %30, %cst_19 {dimension_numbers = #tpu.dot_dimension_numbers<[1], [0], [0], [1], [0, 0, 1, 1], [], []>} : vector<8x32xf32>, vector<32x4xf32>, vector<8x4xf32> -> vector<8x4xf32>
    %32 = vector.shape_cast %16 : vector<8x32xf32> to vector<8x1x32xf32>
    %33 = vector.broadcast %32 : vector<8x1x32xf32> to vector<8x16x32xf32>
    %34 = arith.mulf %26, %33 : vector<8x16x32xf32>
    %35 = vector.shape_cast %34 : vector<8x16x32xf32> to vector<128x32xf32>
    %c0_20 = arith.constant 0 : index
    %c0_21 = arith.constant 0 : index
    %36 = vector.load %arg10[%c0_20, %c0_21] : memref<32x4xf32, #tpu.memory_space<vmem>>, vector<32x4xf32>
    %cst_22 = arith.constant dense<0.000000e+00> : vector<128x4xf32>
    %37 = tpu.matmul %35, %36, %cst_22 {dimension_numbers = #tpu.dot_dimension_numbers<[1], [0], [0], [1], [0, 0, 1, 1], [], []>} : vector<128x32xf32>, vector<32x4xf32>, vector<128x4xf32> -> vector<128x4xf32>
    %38 = vector.shape_cast %37 : vector<128x4xf32> to vector<8x16x4xf32>
    %cst_23 = arith.constant dense<0xFF800000> : vector<8x4xf32>
    %39 = vector.multi_reduction <maximumf>, %38, %cst_23 [1] : vector<8x16x4xf32> to vector<8x4xf32>
    %40 = arith.maximumf %31, %39 : vector<8x4xf32>
    %41 = arith.subf %31, %40 : vector<8x4xf32>
    %42 = math.exp %41 : vector<8x4xf32>
    %43 = vector.shape_cast %40 : vector<8x4xf32> to vector<8x1x4xf32>
    %44 = vector.broadcast %43 : vector<8x1x4xf32> to vector<8x16x4xf32>
    %45 = arith.subf %38, %44 : vector<8x16x4xf32>
    %46 = math.exp %45 : vector<8x16x4xf32>
    %cst_24 = arith.constant dense<0.000000e+00> : vector<8x4xf32>
    %47 = vector.multi_reduction <add>, %46, %cst_24 [1] : vector<8x16x4xf32> to vector<8x4xf32>
    %48 = arith.addf %42, %47 : vector<8x4xf32>
    %49 = tpu.reciprocal %48 {approx = true} : vector<8x4xf32> -> vector<8x4xf32>
    %50 = arith.mulf %42, %49 : vector<8x4xf32>
    %51 = vector.shape_cast %49 : vector<8x4xf32> to vector<8x1x4xf32>
    %52 = vector.broadcast %51 : vector<8x1x4xf32> to vector<8x16x4xf32>
    %53 = arith.mulf %46, %52 : vector<8x16x4xf32>
    %c0_25 = arith.constant 0 : index
    %c0_26 = arith.constant 0 : index
    %54 = vector.load %arg11[%c0_25, %c0_26] : memref<4x32xf32, #tpu.memory_space<vmem>>, vector<4x32xf32>
    %cst_27 = arith.constant dense<0.000000e+00> : vector<8x32xf32>
    %55 = tpu.matmul %50, %54, %cst_27 {dimension_numbers = #tpu.dot_dimension_numbers<[1], [0], [0], [1], [0, 0, 1, 1], [], []>} : vector<8x4xf32>, vector<4x32xf32>, vector<8x32xf32> -> vector<8x32xf32>
    %56 = vector.shape_cast %53 : vector<8x16x4xf32> to vector<128x4xf32>
    %c0_28 = arith.constant 0 : index
    %c0_29 = arith.constant 0 : index
    %57 = vector.load %arg11[%c0_28, %c0_29] : memref<4x32xf32, #tpu.memory_space<vmem>>, vector<4x32xf32>
    %cst_30 = arith.constant dense<0.000000e+00> : vector<128x32xf32>
    %58 = tpu.matmul %56, %57, %cst_30 {dimension_numbers = #tpu.dot_dimension_numbers<[1], [0], [0], [1], [0, 0, 1, 1], [], []>} : vector<128x4xf32>, vector<4x32xf32>, vector<128x32xf32> -> vector<128x32xf32>
    %59 = vector.shape_cast %58 : vector<128x32xf32> to vector<8x16x32xf32>
    %60 = arith.mulf %55, %18 : vector<8x32xf32>
    %61 = arith.mulf %59, %28 : vector<8x16x32xf32>
    %cst_31 = arith.constant dense<0.000000e+00> : vector<8x32xf32>
    %62 = vector.multi_reduction <add>, %61, %cst_31 [1] : vector<8x16x32xf32> to vector<8x32xf32>
    %63 = arith.addf %60, %62 : vector<8x32xf32>
    %c0_32 = arith.constant 0 : index
    %c0_33 = arith.constant 0 : index
    %64 = vector.load %arg8[%c0_32, %c0_33] : memref<32x64xf32, #tpu.memory_space<vmem>>, vector<32x64xf32>
    %cst_34 = arith.constant dense<0.000000e+00> : vector<8x64xf32>
    %65 = tpu.matmul %63, %64, %cst_34 {dimension_numbers = #tpu.dot_dimension_numbers<[1], [0], [0], [1], [0, 0, 1, 1], [], []>} : vector<8x32xf32>, vector<32x64xf32>, vector<8x64xf32> -> vector<8x64xf32>
    %c0_35 = arith.constant 0 : index
    %c0_36 = arith.constant 0 : index
    %66 = vector.load %arg9[%c0_35, %c0_36] : memref<1x64xf32, #tpu.memory_space<vmem>>, vector<1x64xf32>
    %67 = vector.broadcast %66 : vector<1x64xf32> to vector<8x64xf32>
    %68 = arith.addf %65, %67 : vector<8x64xf32>
    %c0_37 = arith.constant 0 : index
    %c0_38 = arith.constant 0 : index
    %69 = vector.load %arg12[%c0_37, %c0_38] : memref<8x64xf32, #tpu.memory_space<vmem>>, vector<8x64xf32>
    tpu.vector_store %arg12[%c0_37, %c0_38], %68 {strides = array<i32>} : memref<8x64xf32, #tpu.memory_space<vmem>>, vector<8x64xf32>,
    return
  }
  func.func @transform_0(%arg0: i32) -> (i32, i32, i32) {
    %c0_i32 = arith.constant 0 : i32
    %c0_i32_0 = arith.constant 0 : i32
    %c0_i32_1 = arith.constant 0 : i32
    return %arg0, %c0_i32, %c0_i32_0 : i32, i32, i32
  }
  func.func @transform_1(%arg0: i32) -> (i32, i32) {
    %c0_i32 = arith.constant 0 : i32
    %c0_i32_0 = arith.constant 0 : i32
    %c0_i32_1 = arith.constant 0 : i32
    return %c0_i32, %c0_i32_0 : i32, i32
  }
  func.func @transform_2(%arg0: i32) -> (i32, i32) {
    %c0_i32 = arith.constant 0 : i32
    %c0_i32_0 = arith.constant 0 : i32
    %c0_i32_1 = arith.constant 0 : i32
    return %c0_i32, %c0_i32_0 : i32, i32
  }
  func.func @transform_3(%arg0: i32) -> (i32, i32) {
    %c0_i32 = arith.constant 0 : i32
    %c0_i32_0 = arith.constant 0 : i32
    %c0_i32_1 = arith.constant 0 : i32
    return %c0_i32, %c0_i32_0 : i32, i32
  }
  func.func @transform_4(%arg0: i32) -> (i32, i32) {
    %c0_i32 = arith.constant 0 : i32
    %c0_i32_0 = arith.constant 0 : i32
    %c0_i32_1 = arith.constant 0 : i32
    return %c0_i32, %c0_i32_0 : i32, i32
  }
  func.func @transform_5(%arg0: i32) -> (i32, i32) {
    %c0_i32 = arith.constant 0 : i32
    %c0_i32_0 = arith.constant 0 : i32
    %c0_i32_1 = arith.constant 0 : i32
    return %c0_i32, %c0_i32_0 : i32, i32
  }
  func.func @transform_6(%arg0: i32) -> (i32, i32) {
    %c0_i32 = arith.constant 0 : i32
    %c0_i32_0 = arith.constant 0 : i32
    %c0_i32_1 = arith.constant 0 : i32
    return %c0_i32, %c0_i32_0 : i32, i32
  }
  func.func @transform_7(%arg0: i32) -> (i32, i32) {
    %c0_i32 = arith.constant 0 : i32
    %c0_i32_0 = arith.constant 0 : i32
    %c0_i32_1 = arith.constant 0 : i32
    return %c0_i32, %c0_i32_0 : i32, i32
  }
  func.func @transform_8(%arg0: i32) -> (i32, i32) {
    %c0_i32 = arith.constant 0 : i32
    %c0_i32_0 = arith.constant 0 : i32
    %c0_i32_1 = arith.constant 0 : i32
    return %c0_i32, %c0_i32_0 : i32, i32
  }
  func.func @transform_9(%arg0: i32) -> (i32, i32) {
    %c0_i32 = arith.constant 0 : i32
    %c0_i32_0 = arith.constant 0 : i32
    %c0_i32_1 = arith.constant 0 : i32
    return %c0_i32, %c0_i32_0 : i32, i32
  }
  func.func @transform_10(%arg0: i32) -> (i32, i32) {
    %c0_i32 = arith.constant 0 : i32
    %c0_i32_0 = arith.constant 0 : i32
    %c0_i32_1 = arith.constant 0 : i32
    return %c0_i32, %c0_i32_0 : i32, i32
  }
  func.func @transform_11(%arg0: i32) -> (i32, i32) {
    %c0_i32 = arith.constant 0 : i32
    %c0_i32_0 = arith.constant 0 : i32
    return %arg0, %c0_i32 : i32, i32
  }
}

</mosaic_0001>

<bundles_post_ra>
// kernel: tpu_custom_call.1
= control target key start
LH: loop header
LB: loop body
LE: loop exit
PB: predicated region body
PF: predicated region fallthrough
CT: control target
= control target key end

     0   :  { %s2937_s0 = inlined_call_operand.hbm [shape: f32[16,16,32], index: 0, kind: input, shape index: {}]   ;;  %s2938_s1 = inlined_call_operand.vmem [shape: f32[1,32], index: 1, kind: input, shape index: {}]   ;;  %s2939_s2 = inlined_call_operand.hbm [shape: f32[16,32], index: 2, kind: input, shape index: {}]   ;;  %s2940_s3 = inlined_call_operand.vmem [shape: f32[32,96], index: 3, kind: input, shape index: {}]   ;;  %s2941_s4 = inlined_call_operand.vmem [shape: f32[1,96], index: 4, kind: input, shape index: {}]   ;;  %s2942_s5 = inlined_call_operand.hbm [shape: f32[32,64], index: 5, kind: input, shape index: {}]   ;;  %s2943_s6 = inlined_call_operand.vmem [shape: f32[1,64], index: 6, kind: input, shape index: {}]   ;;  %s2944_s7 = inlined_call_operand.hbm [shape: f32[32,64], index: 7, kind: input, shape index: {}]   ;;  %s2945_s8 = inlined_call_operand.hbm [shape: f32[1,64], index: 8, kind: input, shape index: {}]   ;;  %s2946_s9 = inlined_call_operand.vmem [shape: f32[32,4], index: 9, kind: input, shape index: {}]   ;;  %s2947_s10 = inlined_call_operand.vmem [shape: f32[4,32], index: 10, kind: input, shape index: {}]   ;;  %s2948_s11 = inlined_call_operand.hbm [shape: f32[16,64], index: 11, kind: output, shape index: {}]  }
   0x1   :  { %2952 = sst [smem:[#allocation17_spill]] %s2939_s2 }
   0x2   :  { %2953 = sst [smem:[#allocation18_spill]] %s2942_s5 }
   0x3   :  { %2954 = sst [smem:[#allocation19_spill]] %s2944_s7 }
   0x4   :  { %2955 = sst [smem:[#allocation20_spill]] %s2945_s8 }
   0x5   :  { %16 = vsyncpa [#allocation3], 0 }
   0x6   :  { %18 = vsyncpa [#allocation3 + $0x1], 0 }
   0x7   :  { %19 = vsyncpa [#allocation6], 0 }
   0x8   :  { %20 = vsyncpa [#allocation9], 0 }
   0x9   :  { %21 = vsyncpa [#allocation4], 0 }
   0xa   :  { %23 = vsyncpa [#allocation4 + $0x1], 0  ;;  %s2254_s17 = smov 0   ;;  %s2256_s18 = smov 0  }
   0xb   :  { %s2258_s19 = smov 0   ;;  %s2260_s20 = smov 0  }
   0xc LB: > { %s2275_s21 = sadd.s32 4294967295, %s2183_s20   ;;  %s1738_s22 = sadd.s32 4294967294, %s2183_s20   ;;  %s2183_s20 = sphi %s2260_s20, %s2974_s20   ;;  %s2179_s19 = sphi %s2258_s19, %s2973_s19   ;;  %s2175_s18 = sphi %s2256_s18, %s2972_s18   ;;  %s2171_s17 = sphi %s2254_s17, %s2971_s17  }
   0xd   : > { %p49_p0 = scmp.ne.s32.totalorder %s2175_s18, %s2171_s17  ;;  %p50_p1 = scmp.eq.s32.totalorder %s2275_s21, 0 }
   0xe   : > { %p283_p2 = scmp.eq.s32.totalorder %s2275_s21, 1  ;;  %p289_p3 = scmp.eq.s32.totalorder %s1738_s22, 1 }
   0xf   : > { %p2284_p4 = por %p50_p1, %p49_p0  ;;  %p1739_p5 = scmp.ge.s32.totalorder %s2183_s20, 1 }
  0x10   : > { %p2289_p6 = por %p289_p3, %p49_p0  ;;  %p296_p7 = scmp.lt.s32.totalorder %s2183_s20, 3 }
  0x11   : > { %s2959_s2 = sld [smem:[#allocation17_spill]]  ;;  %s2185_s29 = smov [#allocation5]  }
  0x12   : > { %s2957_s24 = scalar_select %p2289_p6, 1, 0 }
  0x13   : > { %p2297_p8 = pnand %p1739_p5, %p296_p7  ;;  %s312_s30 = sshll.u32 %s2185_s29, 4  ;;  %s313_s30 = int_to_ptr.vmem [resolvable:$true] %s312_s30 }
  0x14   : > { %2958 = sst [smem:[#allocation16_spill]] %s2957_s24  ;;  %s2950_s16 = smov 128  }
  0x15   : > { %p1845_p9 = pneg %p2297_p8  ;;  %s2962_s7 = sld [smem:[#allocation19_spill]] }
  0x16   : > { %s2951_s22 = smov 8   ;;  %s2188_s25 = smov [#allocation8]  }
  0x17   : > { %s310_s27 = sshll.u32 %s2959_s2, 4  ;;  %p2305_p10 = pnand %p1845_p9, %p50_p1  ;;  %s311_s27 = int_to_ptr.hbm [resolvable:$true] %s310_s27 }
  0x18   : > { %s349_s26 = sshll.u32 %s2188_s25, 4  ;;  %s2963_s5 = sld [smem:[#allocation18_spill]]  ;;  %s350_s26 = int_to_ptr.vmem [resolvable:$true] %s349_s26 }
  0x19   : > { %1848 = dma.hbm_to_vmem [thread:$0]  (!%p2305_p10), %s311_s27, 256, %s313_s30, [#allocation6], %s2950_s16, %s2950_s16, %s2951_s22  }
  0x1a   : > { %s2964_s8 = sld [smem:[#allocation20_spill]]  ;;  %s2189_s14 = smov [#allocation7]  }
  0x1b   : > { %s347_s15 = sshll.u32 %s2962_s7, 4  ;;  %s332_s2 = sshll.u32 %s2189_s14, 4  ;;  %s348_s15 = int_to_ptr.hbm [resolvable:$true] %s347_s15  ;;  %s333_s2 = int_to_ptr.vmem [resolvable:$true] %s332_s2 }
  0x1c   : > { %1854 = dma.hbm_to_vmem [thread:$0]  (!%p2305_p10), %s348_s15, 512, %s350_s26, [#allocation9], %s2950_s16, %s2950_s16, %s2951_s22  }
  0x1d   : > { %s2190_s25 = smov [#allocation10]   ;;  %s2337_s26 = sadd.s32 1, %s2183_s20  }
  0x1e   : > { %s330_s24 = sshll.u32 %s2963_s5, 4  ;;  %s364_s15 = sshll.u32 %s2190_s25, 4  ;;  %s331_s24 = int_to_ptr.hbm [resolvable:$true] %s330_s24  ;;  %s365_s15 = int_to_ptr.vmem [resolvable:$true] %s364_s15 }
  0x1f   : > { %1851 = dma.hbm_to_vmem [thread:$0]  (!%p2305_p10), %s331_s24, 512, %s333_s2, [#allocation6], %s2950_s16, %s2950_s16, %s2951_s22  }
  0x20   : > { %s362_s13 = sshll.u32 %s2964_s8, 4  ;;  %s36_s29 = sadd.s32 1, %s2179_s19  ;;  %s363_s13 = int_to_ptr.hbm [resolvable:$true] %s362_s13 }
  0x21   : > { %1857 = dma.hbm_to_vmem [thread:$0]  (!%p2305_p10), %s363_s13, 16, %s365_s15, [#allocation9]  }
  0x22   : > { %s33_s27 = ssub.s32 %s2183_s20, %s2337_s26  ;;  %p43_p12 = scmp.ne.s32.totalorder %s2179_s19, %s2175_s18 }
  0x23   : > { %p34_p13 = scmp.eq.s32.totalorder %s33_s27, 0  ;;  %p44_p0 = scmp.eq.s32.totalorder %s2183_s20, 0 }
  0x24   : > { %p2347_p3 = por %p283_p2, %p43_p12  ;;  %p1870_p5 = scmp.lt.s32.totalorder %s2183_s20, 2 }
  0x25   : > { %s2353_s24 = scalar_select %p34_p13, %s2179_s19, %s36_s29  }
  0x26   : > { %p45_p7 = por %p44_p0, %p43_p12  ;;  %s381_s14 = sand.u32 1, %s2179_s19  }
  0x27   : > { %s1745_s12 = sshll.u32 %s381_s14, 7  ;;  %s1815_s13 = sshll.u32 %s2183_s20, 7 }
  0x28   : > { %s391_s15 = scalar_lea.hbm %s2937_s0, %s1815_s13  ;;  %s385_s16 = scalar_lea.vmem [#allocation2], %s1745_s12 }
  0x29   : > { %s394_s22 = sshll.u32 %s385_s16, 4  ;;  %s392_s27 = sshll.u32 %s391_s15, 4  ;;  %s395_s22 = int_to_ptr.vmem [resolvable:$true] %s394_s22  ;;  %s393_s27 = int_to_ptr.hbm [resolvable:$true] %s392_s27 }
  0x2a   : > { %p2360_p2 = pnand %p1870_p5, %p45_p7  ;;  %s382_s29 = scalar_lea.sflag [#allocation3], %s381_s14 }
  0x2b   : > { %s2079_s7 = sshra.s32 %s393_s27, 4  ;;  %s2086_s16 = scalar_lea.hbm %s2937_s0, 256  ;;  %s2080_s7 = int_to_ptr.hbm [resolvable:$true] %s2079_s7 }
  0x2c   : > { %s2081_s8 = scalar_lea.hbm %s2080_s7, 128  ;;  %p2083_p10 = pneg %p2360_p2 }
  0x2d   : > { %p2082_p9 = scmp.ne.s32.totalorder %s2080_s7, %s2081_s8  ;;  %p2087_p0 = scmp.lt.s32.totalorder %s2080_s7, %s2937_s0 }
  0x2e   : > { %p2088_p5 = scmp.lt.s32.totalorder %s2086_s16, %s2081_s8 }
  0x2f   : > { %p2084_p12 = pnand %p2083_p10, %p2082_p9 }
  0x30   : > { %p2089_p7 = por %p2088_p5, %p2087_p0 }
  0x31   : > { %p2085_p13 = pneg %p2084_p12 }
  0x33   : > { %p2090_p11 = pnand %p2089_p7, %p2085_p13 }
  0x35   : > { %2093 = shalt.err (!%p2090_p11)
}
  0x36   : > { %s2967_s14 = smov 8   ;;  %s2968_s15 = smov 128  }
  0x37   : > { %1861 = dma.hbm_to_vmem [thread:$0]  (!%p2360_p2), %s393_s27, 2048, %s395_s22, %s382_s29, %s2968_s15, %s2968_s15, %s2967_s14  }
  0x38   : > { %406 = sbr.rel (%p2297_p8) target bundleno = 917 (0x395), region = 64  ;;  %s2380_s13 = sand.u32 (!%p2297_p8), 1, %s2175_s18  }
  0x39   : > { %s1750_s7 = sshll.u32 (!%p2297_p8), %s2380_s13, 7  ;;  %s409_s8 = scalar_lea.sflag (!%p2297_p8), [#allocation3], %s2380_s13 }
  0x3a   : > { %s2384_s12 = scalar_lea.vmem (!%p2297_p8), [#allocation2], %s1750_s7 }
  0x3d   : > { %2154 = dma.done.wait (%p2284_p4), %s409_s8, 2048  }
  0x3e   : > { %2156 = vsyncadd (%p2284_p4), %s409_s8, 4294965248 }
  0x3f   : > { %2158 = dma.done.wait (%p50_p1), [#allocation6], 768  }
  0x40   : > { %2160 = vsyncadd (%p50_p1), [#allocation6], 4294966528 }
  0x41   : > { %2162 = dma.done.wait (%p50_p1), [#allocation9], 528  }
  0x42   : > { %2164 = vsyncadd (%p50_p1), [#allocation9], 4294966768  ;;  %v2191_v0 = vmov 16.0   ;;  %vm489_vm0 = vcmask 261120   ;;  %v2398_v2 = vld [vmem:[#allocation7 + $0x18] sm:$0xff]  ;;  %v2400_v3 = vld [vmem:[#allocation7 + $0x10] sm:$0xff] }
  0x43   : > { %1921 = vrcp.f32 %v2191_v0  ;;  %1816 = vmatpush.msra.mxu1 %v2398_v2  ;;  %v2404_v4 = vld [vmem:[%s2384_s12 + $0x10] sm:$0xff]  ;;  %v476_v5 = vld [vmem:[%s2384_s12 + $0x18] sm:$0xff]  ;;  %v2415_v13 = vld [vmem:[#allocation5 + $0x8] sm:$0xff]  ;;  %vm624_vm2 = vcmask 1041409   ;;  %vm627_vm3 = vcmask 1042434   ;;  %vm630_vm4 = vcmask 1043459  }
  0x44   : > { %v2407_v7 = vld [vmem:[#allocation7 + $0x8] sm:$0xff]  ;;  %v2409_v8 = vld [vmem:[#allocation7] sm:$0xff]  ;;  %v499_v9 = vsel %vm489_vm0, %v2404_v4, 0.0  ;;  %v500_v10 = vsel %vm489_vm0, %v476_v5, 0.0  ;;  %v477_v14 = vld [vmem:[%s2384_s12 + $0x20] sm:$0xff]  ;;  %v594_v16 = vadd.f32 %v2415_v13, %v476_v5  ;;  %vm633_vm5 = vcmask 1044484  }
  0x45   : > { %1817 = vmatpush.msra.mxu1 %v2400_v3  ;;  %v501_v11 = vadd.f32 %v500_v10, %v499_v9  ;;  %v2418_v15 = vld [vmem:[#allocation5] sm:$0xff]  ;;  %v508_v17 = vsel %vm489_vm0, %v477_v14, 0.0  ;;  %v610_v18 = vld [vmem:[%s2940_s3 + $0x18] sm:$0xff]  ;;  %v609_v19 = vld [vmem:[%s2940_s3 + $0x10] sm:$0xff]  ;;  %vm636_vm6 = vcmask 1045509   ;;  %vm639_vm7 = vcmask 1046534  }
  0x46   : > { %v478_v20 = vld [vmem:[%s2384_s12 + $0x28] sm:$0xff]  ;;  %658 = vmatpush.msra.mxu0 %v610_v18  ;;  %v2435_v25 = vld [vmem:[%s2384_s12] sm:$0xff]  ;;  %v595_v26 = vadd.f32 %v2418_v15, %v477_v14  ;;  %v2445_v30 = vld [vmem:[%s2384_s12 + $0x30] sm:$0xff]  ;;  %vm642_vm8 = vcmask 1047559   ;;  %s2192_s27 = smov 96   ;;  %s2193_s14 = smov 64  }
  0x47   : > { %1818 = vmatpush.msra.mxu1 %v2407_v7  ;;  %v502_v21 = vrot.slane %v501_v11, 4  ;;  %v509_v23 = vsel %vm489_vm0, %v478_v20, 0.0  ;;  %v608_v24 = vld [vmem:[%s2940_s3 + $0x8] sm:$0xff]  ;;  %v2439_v28 = vadd.f32 %v2415_v13, %v478_v20  ;;  %v2448_v31 = vld [vmem:[%s2384_s12 + $0x38] sm:$0xff]  ;;  %v490_v32 = vsel %vm489_vm0, %v2435_v25, 0.0  ;;  %v2454_v35 = vld [vmem:[%s2384_s12 + $0x40] sm:$0xff] }
  0x48   : > { %v510_v27 = vadd.f32 %v509_v23, %v508_v17  ;;  %v2442_v29 = vld [vmem:[%s2384_s12 + $0x8] sm:$0xff]  ;;  %659 = vmatpush.msra.mxu0 %v609_v19  ;;  %v2460_v37 = vld [vmem:[%s2384_s12 + $0x50] sm:$0xff]  ;;  %v517_v39 = vsel %vm489_vm0, %v2445_v30, 0.0  ;;  %v607_v41 = vld [vmem:[%s2940_s3] sm:$0xff]  ;;  %v518_v45 = vsel %vm489_vm0, %v2448_v31, 0.0  ;;  %v526_v46 = vsel %vm489_vm0, %v2454_v35, 0.0 }
  0x49   : > { %v1922_v1 = vpop.eup %1921  ;;  %1819 = vmatpush.msra.mxu1 %v2409_v8  ;;  %v503_v33 = vadd.f32 %v502_v21, %v501_v11  ;;  %v2457_v36 = vld [vmem:[%s2384_s12 + $0x48] sm:$0xff]  ;;  %v491_v38 = vsel %vm489_vm0, %v2442_v29, 0.0  ;;  %v2471_v42 = vld [vmem:[%s2384_s12 + $0x58] sm:$0xff]  ;;  %v2474_v43 = vld [vmem:[%s2384_s12 + $0x60] sm:$0xff]  ;;  %v519_v51 = vadd.f32 %v518_v45, %v517_v39  ;;  %v535_v56 = vsel %vm489_vm0, %v2460_v37, 0.0  ;;  %s1755_s8 = sshll.u32 %s2380_s13, 3 }
  0x4a   : > { %v563_v6 = vmul.f32 16.0, %v1922_v1  ;;  %vm567_vm1 = vweird.f32 %v1922_v1  ;;  %1760 = vmatmul.msk.f32.vlgmr.msra.gmra.mxu1 %vm489_vm0, %v594_v16  ;;  %v511_v40 = vrot.slane %v510_v27, 4  ;;  %v492_v44 = vadd.f32 %v491_v38, %v490_v32  ;;  %660 = vmatpush.msra.mxu0 %v608_v24  ;;  %v2484_v49 = vld [vmem:[%s2384_s12 + $0x68] sm:$0xff]  ;;  %v2487_v50 = vld [vmem:[%s2384_s12 + $0x70] sm:$0xff]  ;;  %v2498_v62 = vld [vmem:[%s2384_s12 + $0x78] sm:$0xff]  ;;  %s1811_s12 = sshll.u32 %s2275_s21, 3 }
  0x4b   : > { %v504_v47 = vrot.slane %v503_v33, 2  ;;  %v527_v52 = vsel %vm489_vm0, %v2457_v36, 0.0  ;;  %v520_v58 = vrot.slane %v519_v51, 4  ;;  %v536_v59 = vsel %vm489_vm0, %v2471_v42, 0.0  ;;  %v2509_v18 = vld [vmem:[%s2938_s1] ss:$0 sm:$0xff]  ;;  %s1625_s28 = scalar_lea.hbm %s2948_s11, %s1811_s12 }
  0x4c   : > { %v564_v12 = vsub.f32 1.0, %v563_v6  ;;  %v512_v53 = vadd.f32 %v511_v40, %v510_v27  ;;  %v493_v54 = vrot.slane %v492_v44, 4  ;;  %v528_v55 = vadd.f32 %v527_v52, %v526_v46  ;;  %661 = vmatpush.msra.mxu0 %v607_v41  ;;  %s471_s22 = scalar_lea.vmem [#allocation11], %s1755_s8  ;;  %s1629_s29 = sshll.u32 %s1625_s28, 4  ;;  %s1630_s29 = int_to_ptr.hbm [resolvable:$true] %s1629_s29 }
  0x4d   : > { %v505_v57 = vadd.f32 %v504_v47, %v503_v33  ;;  %v544_v60 = vsel %vm489_vm0, %v2474_v43, 0.0  ;;  %v521_v6 = vadd.f32 %v520_v58, %v519_v51  ;;  %v545_v9 = vsel %vm489_vm0, %v2484_v49, 0.0  ;;  %s1615_s16 = scalar_lea.sflag [#allocation4], %s2380_s13  ;;  %s2123_s2 = sshra.s32 %s1630_s29, 4  ;;  %s2124_s2 = int_to_ptr.hbm [resolvable:$true] %s2123_s2 }
  0x4e   : > { %v565_v22 = vmul.f32 %v1922_v1, %v564_v12  ;;  %v513_v61 = vrot.slane %v512_v53, 2  ;;  %v494_v63 = vadd.f32 %v493_v54, %v492_v44  ;;  %v529_v0 = vrot.slane %v528_v55, 4  ;;  %734 = vmatpush.msrb.mxu0 %v2398_v2  ;;  %s2125_s25 = scalar_lea.hbm %s2124_s2, 8  ;;  %s2129_s15 = scalar_lea.hbm %s2948_s11, 16 }
  0x4f   : > { %v506_v5 = vrot.slane %v505_v57, 1  ;;  %v553_v10 = vsel %vm489_vm0, %v2487_v50, 0.0  ;;  %v522_v2 = vrot.slane %v521_v6, 2  ;;  %v546_v19 = vadd.f32 %v545_v9, %v544_v60  ;;  %p2126_p1 = scmp.ne.s32.totalorder %s2124_s2, %s2125_s25  ;;  %p2130_p11 = scmp.lt.s32.totalorder %s2124_s2, %s2948_s11 }
  0x50   : > { %v566_v34 = vadd.f32 %v1922_v1, %v565_v22  ;;  %v514_v11 = vadd.f32 %v513_v61, %v512_v53  ;;  %v495_v12 = vrot.slane %v494_v63, 2  ;;  %v530_v14 = vadd.f32 %v529_v0, %v528_v55  ;;  %735 = vmatpush.msrb.mxu0 %v2400_v3  ;;  %p2131_p2 = scmp.lt.s32.totalorder %s2129_s15, %s2125_s25 }
  0x51   : > { %v507_v17 = vadd.f32 %v506_v5, %v505_v57  ;;  %v554_v20 = vsel %vm489_vm0, %v2498_v62, 0.0  ;;  %v523_v27 = vadd.f32 %v522_v2, %v521_v6  ;;  %v547_v32 = vrot.slane %v546_v19, 4  ;;  %p2127_p4 = pnand %p2126_p1, %p2347_p3 }
  0x52   : > { %v2481_v48 = vsel %vm567_vm1, %v1922_v1, %v566_v34  ;;  %v537_v1 = vadd.f32 %v536_v59, %v535_v56  ;;  %1761 = vmatmul.msk.f32.gmra.mxu1 %vm489_vm0, %v595_v26  ;;  %v515_v21 = vrot.slane %v514_v11, 1  ;;  %v496_v22 = vadd.f32 %v495_v12, %v494_v63  ;;  %736 = vmatpush.msrb.mxu0 %v2407_v7  ;;  %p2132_p9 = por %p2131_p2, %p2130_p11 }
  0x53   : > { %v531_v23 = vrot.slane %v530_v14, 2  ;;  %v570_v3 = vmul.f32 %v2481_v48, %v507_v17  ;;  %v555_v33 = vadd.f32 %v554_v20, %v553_v10  ;;  %v524_v26 = vrot.slane %v523_v27, 1  ;;  %p2128_p8 = pneg %p2127_p4 }
  0x54   : > { %v538_v16 = vrot.slane %v537_v1, 4  ;;  %v516_v34 = vadd.f32 %v515_v21, %v514_v11  ;;  %v497_v38 = vrot.slane %v496_v22, 1  ;;  %737 = vmatpush.msrb.mxu0 %v2409_v8  ;;  %v548_v44 = vadd.f32 %v547_v32, %v546_v19 }
  0x55   : > { %v532_v39 = vadd.f32 %v531_v23, %v530_v14  ;;  %v582_v41 = vadd.f32 %v2509_v18, %v570_v3  ;;  %v556_v45 = vrot.slane %v555_v33, 4  ;;  %v525_v53 = vadd.f32 %v524_v26, %v523_v27  ;;  %p2133_p10 = pnand %p2132_p9, %p2128_p8 }
  0x56   : > { %v539_v24 = vadd.f32 %v538_v16, %v537_v1  ;;  %v571_v46 = vmul.f32 %v2481_v48, %v516_v34  ;;  %v498_v47 = vadd.f32 %v497_v38, %v496_v22  ;;  %v549_v54 = vrot.slane %v548_v44, 2 }
  0x57   : > { %v533_v7 = vrot.slane %v532_v39, 1  ;;  %v623_v52 = vrot.slane %v582_v41, 7  ;;  %v557_v55 = vadd.f32 %v556_v45, %v555_v33  ;;  %v572_v61 = vmul.f32 %v2481_v48, %v525_v53  ;;  %v1919_v53 = vld [vmem:[%s2941_s4] ss:$0 sm:$0xff] }
  0x58   : > { %v540_v40 = vrot.slane %v539_v24, 2  ;;  %v583_v56 = vadd.f32 %v2509_v18, %v571_v46  ;;  %v569_v8 = vmul.f32 %v2481_v48, %v498_v47  ;;  %v550_v59 = vadd.f32 %v549_v54, %v548_v44 }
  0x59   : > { %v534_v57 = vadd.f32 %v533_v7, %v532_v39  ;;  %v558_v60 = vrot.slane %v557_v55, 2  ;;  %v584_v10 = vadd.f32 %v2509_v18, %v572_v61  ;;  %v597_v21 = vadd.f32 %v2418_v15, %v2445_v30 }
  0x5a   : > { %v541_v51 = vadd.f32 %v540_v40, %v539_v24  ;;  %1762 = vmatmul.msk.f32.gmra.mxu1 %vm489_vm0, %v2439_v28  ;;  %v581_v1 = vadd.f32 %v2509_v18, %v569_v8  ;;  %v626_v5 = vrot.slane %v583_v56, 6  ;;  %v551_v6 = vrot.slane %v550_v59, 1 }
  0x5b   : > { %v573_v0 = vmul.f32 %v2481_v48, %v534_v57  ;;  %v559_v9 = vadd.f32 %v558_v60, %v557_v55  ;;  %v629_v2 = vrot.slane %v584_v10, 5  ;;  %v598_v41 = vadd.f32 %v2415_v13, %v2448_v31 }
  0x5c   : > { %v542_v58 = vrot.slane %v541_v51, 1  ;;  %v625_v14 = vsel %vm624_vm2, %v623_v52, %v581_v1  ;;  %v552_v16 = vadd.f32 %v551_v6, %v550_v59  ;;  %v604_v44 = vadd.f32 %v2415_v13, %v2484_v49 }
  0x5d   : > { %v585_v12 = vadd.f32 %v2509_v18, %v573_v0  ;;  %v560_v28 = vrot.slane %v559_v9, 1  ;;  %v628_v17 = vsel %vm627_vm3, %v626_v5, %v625_v14  ;;  %v592_v31 = vadd.f32 %v2415_v13, %v2442_v29 }
  0x5e   : > { %v543_v63 = vadd.f32 %v542_v58, %v541_v51  ;;  %v575_v23 = vmul.f32 %v2481_v48, %v552_v16  ;;  %v631_v24 = vsel %vm630_vm4, %v629_v2, %v628_v17  ;;  %v600_v45 = vadd.f32 %v2415_v13, %v2457_v36 }
  0x5f   : > { %v632_v20 = vrot.slane %v585_v12, 4  ;;  %v561_v22 = vadd.f32 %v560_v28, %v559_v9  ;;  %v601_v46 = vadd.f32 %v2418_v15, %v2460_v37  ;;  %v606_v29 = vadd.f32 %v2415_v13, %v2498_v62 }
  0x60   : > { %v574_v11 = vmul.f32 %v2481_v48, %v543_v63  ;;  %v587_v33 = vadd.f32 %v2509_v18, %v575_v23  ;;  %v602_v36 = vadd.f32 %v2415_v13, %v2471_v42  ;;  %v603_v49 = vadd.f32 %v2418_v15, %v2474_v43  ;;  %v795_v13 = vld [vmem:[%s2946_s9 + $0x18] sm:$0xff]  ;;  %v794_v42 = vld [vmem:[%s2946_s9 + $0x10] sm:$0xff]  ;;  %v793_v43 = vld [vmem:[%s2946_s9 + $0x8] sm:$0xff] }
  0x61   : > { %v634_v3 = vsel %vm633_vm5, %v632_v20, %v631_v24  ;;  %v576_v32 = vmul.f32 %v2481_v48, %v561_v22  ;;  %v591_v48 = vadd.f32 %v2418_v15, %v2435_v25  ;;  %v605_v25 = vadd.f32 %v2418_v15, %v2487_v50  ;;  %1820 = vmatpush.msra.mxu3 %v795_v13  ;;  %v792_v50 = vld [vmem:[%s2946_s9] sm:$0xff] }
  0x62   : > { %v586_v19 = vadd.f32 %v2509_v18, %v574_v11  ;;  %1763 = vmatmul.msk.f32.gmra.mxu1 %vm489_vm0, %v597_v21  ;;  %v638_v38 = vrot.slane %v587_v33, 2  ;;  %811 = vmatpush.msra.mxu2 %v795_v13  ;;  %vm971_vm9 = vcmask 31744   ;;  %vm1271_vm10 = vcmask 1043456  }
  0x63   : > { %v588_v30 = vadd.f32 %v2509_v18, %v576_v32  ;;  %v599_v18 = vadd.f32 %v2418_v15, %v2454_v35  ;;  %v593_v35 = vadd.f32 %v2418_v15, %v2404_v4  ;;  %v2584_v4 = vld [vmem:[%s2943_s6] ss:$0 sm:$0xff]  ;;  %1821 = vmatpush.msra.mxu3 %v794_v42  ;;  %vm1612_vm11 = vcmask 523264  }
  0x64   : > { %v635_v27 = vrot.slane %v586_v19, 3  ;;  %812 = vmatpush.msra.mxu2 %v794_v42 }
  0x65   : > { %v641_v40 = vrot.slane %v588_v30, 1  ;;  %1822 = vmatpush.msra.mxu3 %v793_v43 }
  0x66   : > { %v637_v34 = vsel %vm636_vm6, %v635_v27, %v634_v3  ;;  %813 = vmatpush.msra.mxu2 %v793_v43 }
  0x67   : > { %v640_v39 = vsel %vm639_vm7, %v638_v38, %v637_v34  ;;  %1823 = vmatpush.msra.mxu3 %v792_v50 }
  0x68   : > { %v643_v26 = vsel %vm642_vm8, %v641_v40, %v640_v39  ;;  %814 = vmatpush.msra.mxu2 %v792_v50 }
  0x69   : > { %1756 = vmatmul.msk.f32.vlgmr.msra.gmra.mxu0 %vm489_vm0, %v643_v26 }
  0x6a   : > { %1764 = vmatmul.msk.f32.gmra.mxu1 %vm489_vm0, %v598_v41  ;;  %918 = vmatpush.msra.mxu0 %v795_v13 }
  0x6c   : > { %919 = vmatpush.msra.mxu0 %v794_v42 }
  0x6e   : > { %920 = vmatpush.msra.mxu0 %v793_v43 }
  0x70   : > { %921 = vmatpush.msra.mxu0 %v792_v50 }
  0x71   : > { %1757 = vmatmul.msk.f32.vlgmr.msrb.gmra.mxu0 %vm489_vm0, %v591_v48 }
  0x72   : > { %1765 = vmatmul.msk.f32.gmra.mxu1 %vm489_vm0, %v599_v18 }
  0x79   : > { %1758 = vmatmul.msk.f32.gmra.mxu0 %vm489_vm0, %v592_v31 }
  0x7a   : > { %1766 = vmatmul.msk.f32.gmra.mxu1 %vm489_vm0, %v600_v45 }
  0x81   : > { %1759 = vmatmul.msk.f32.gmra.mxu0 %vm489_vm0, %v593_v35 }
  0x82   : > { %1767 = vmatmul.msk.f32.gmra.mxu1 %vm489_vm0, %v601_v46 }
  0x8a   : > { %1768 = vmatmul.msk.f32.gmra.mxu1 %vm489_vm0, %v602_v36 }
  0x92   : > { %1769 = vmatmul.msk.f32.gmra.mxu1 %vm489_vm0, %v603_v49 }
  0x9a   : > { %1770 = vmatmul.msk.f32.gmra.mxu1 %vm489_vm0, %v604_v44 }
  0xa2   : > { %1771 = vmatmul.msk.f32.gmra.mxu1 %vm489_vm0, %v605_v25 }
  0xaa   : > { %1772 = vmatmul.msk.f32.gmra.mxu1 %vm489_vm0, %v606_v29 }
  0xc7   : > { %v748_v37 = vpop.f32.mrf.mxu1 }
  0xc8   : > { %v749_v15 = vadd.f32 %v2584_v4, %v748_v37 }
  0xca   : > { %1434 = vrot.lane.b32.xlu2 %v749_v15, %s2192_s27 }
  0xcf   : > { %v751_v62 = vpop.f32.mrf.mxu1 }
  0xd0   : > { %v752_v47 = vadd.f32 %v2584_v4, %v751_v62 }
  0xd2   : > { %1436 = vrot.lane.b32.xlu2 %v752_v47, %s2192_s27 }
  0xd7   : > { %v754_v7 = vpop.f32.mrf.mxu1 }
  0xd8   : > { %v755_v63 = vadd.f32 %v2584_v4, %v754_v7 }
  0xdf   : > { %v757_v51 = vpop.f32.mrf.mxu1 }
  0xe0   : > { %v758_v52 = vadd.f32 %v2584_v4, %v757_v51 }
  0xe2   : > { %1440 = vrot.lane.b32.xlu1 %v758_v52, %s2192_s27 }
  0xe6   : > { %v663_v54 = vpop.f32.mrf.mxu0 }
  0xe7   : > { %v2607_v55 = vadd.f32 %v1919_v53, %v663_v54  ;;  %v760_v56 = vpop.f32.mrf.mxu1 }
  0xe8   : > { %v761_v58 = vadd.f32 %v2584_v4, %v760_v56 }
  0xe9   : > { %788 = vrot.lane.b32.xlu0 %v2607_v55, %s2192_s27  ;;  %v819_v57 = vrot.slane %v2607_v55, 1  ;;  %v820_v60 = vrot.slane %v2607_v55, 2  ;;  %v826_v1 = vperm.slane %v2607_v55, 0  ;;  %v821_v28 = vrot.slane %v2607_v55, 3 }
  0xea   : > { %1442 = vrot.lane.b32.xlu2 %v761_v58, %s2192_s27  ;;  %v822_v30 = vrot.slane %v2607_v55, 4  ;;  %v823_v44 = vrot.slane %v2607_v55, 5  ;;  %v824_v49 = vrot.slane %v2607_v55, 6  ;;  %v825_v42 = vrot.slane %v2607_v55, 7 }
  0xeb   : > { %v827_v8 = vperm.slane %v819_v57, 0  ;;  %v828_v9 = vperm.slane %v820_v60, 0  ;;  %v829_v22 = vperm.slane %v821_v28, 0 }
  0xec   : > { %v830_v40 = vperm.slane %v822_v30, 0  ;;  %v831_v25 = vperm.slane %v823_v44, 0  ;;  %v832_v13 = vperm.slane %v824_v49, 0  ;;  %v833_v43 = vperm.slane %v825_v42, 0 }
  0xed   : > { %v845_v59 = vmul.f32 %v827_v8, %v749_v15  ;;  %v846_v10 = vmul.f32 %v828_v9, %v752_v47  ;;  %v847_v17 = vmul.f32 %v828_v9, %v755_v63  ;;  %v848_v3 = vmul.f32 %v829_v22, %v758_v52 }
  0xee   : > { %v739_v61 = vpop.f32.mrf.mxu0  ;;  %v849_v34 = vmul.f32 %v829_v22, %v761_v58 }
  0xef   : > { %v740_v0 = vadd.f32 %v2584_v4, %v739_v61  ;;  %1777 = vmatmul.msk.f32.vlgmr.msra.gmra.mxu3 %vm489_vm0, %v845_v59  ;;  %v763_v5 = vpop.f32.mrf.mxu1 }
  0xf0   : > { %v764_v19 = vadd.f32 %v2584_v4, %v763_v5 }
  0xf1   : > { %v842_v6 = vmul.f32 %v826_v1, %v740_v0  ;;  %1438 = vrot.lane.b32.xlu0 %v755_v63, %s2192_s27 }
  0xf2   : > { %v850_v41 = vmul.f32 %v830_v40, %v764_v19 }
  0xf3   : > { %1774 = vmatmul.msk.f32.vlgmr.msra.gmra.mxu0 %vm489_vm0, %v842_v6 }
  0xf6   : > { %v742_v11 = vpop.f32.mrf.mxu0 }
  0xf7   : > { %v743_v12 = vadd.f32 %v2584_v4, %v742_v11  ;;  %1778 = vmatmul.msk.f32.gmra.mxu3 %vm489_vm0, %v846_v10  ;;  %v766_v14 = vpop.f32.mrf.mxu1 }
  0xf8   : > { %v767_v27 = vadd.f32 %v2584_v4, %v766_v14 }
  0xf9   : > { %v843_v16 = vmul.f32 %v826_v1, %v743_v12  ;;  %1430 = vrot.lane.b32.xlu1 %v743_v12, %s2192_s27  ;;  %1428 = vrot.lane.b32.xlu0 %v740_v0, %s2192_s27 }
  0xfa   : > { %v851_v18 = vmul.f32 %v830_v40, %v767_v27 }
  0xfb   : > { %1775 = vmatmul.msk.f32.gmra.mxu0 %vm489_vm0, %v843_v16 }
  0xfe   : > { %v745_v2 = vpop.f32.mrf.mxu0 }
  0xff   : > { %v746_v20 = vadd.f32 %v2584_v4, %v745_v2  ;;  %1779 = vmatmul.msk.f32.gmra.mxu3 %vm489_vm0, %v847_v17  ;;  %v769_v21 = vpop.f32.mrf.mxu1 }
 0x100   : > { %v770_v24 = vadd.f32 %v2584_v4, %v769_v21 }
 0x101   : > { %v844_v23 = vmul.f32 %v827_v8, %v746_v20  ;;  %1432 = vrot.lane.b32.xlu1 %v746_v20, %s2192_s27  ;;  %1444 = vrot.lane.b32.xlu0 %v764_v19, %s2192_s27 }
 0x102   : > { %1448 = vrot.lane.b32.xlu2 %v770_v24, %s2192_s27  ;;  %v852_v35 = vmul.f32 %v831_v25, %v770_v24 }
 0x103   : > { %1776 = vmatmul.msk.f32.gmra.mxu0 %vm489_vm0, %v844_v23 }
 0x107   : > { %1780 = vmatmul.msk.f32.gmra.mxu3 %vm489_vm0, %v848_v3  ;;  %v772_v32 = vpop.f32.mrf.mxu1 }
 0x108   : > { %v773_v33 = vadd.f32 %v2584_v4, %v772_v32 }
 0x109   : > { %1446 = vrot.lane.b32.xlu1 %v767_v27, %s2192_s27 }
 0x10a   : > { %1450 = vrot.lane.b32.xlu0 %v773_v33, %s2192_s27  ;;  %v853_v36 = vmul.f32 %v831_v25, %v773_v33 }
 0x10f   : > { %1781 = vmatmul.msk.f32.gmra.mxu3 %vm489_vm0, %v849_v34  ;;  %v775_v38 = vpop.f32.mrf.mxu1 }
 0x110   : > { %v776_v39 = vadd.f32 %v2584_v4, %v775_v38 }
 0x112   : > { %1452 = vrot.lane.b32.xlu1 %v776_v39, %s2192_s27  ;;  %v854_v37 = vmul.f32 %v832_v13, %v776_v39 }
 0x117   : > { %1782 = vmatmul.msk.f32.gmra.mxu3 %vm489_vm0, %v850_v41  ;;  %v778_v26 = vpop.f32.mrf.mxu1 }
 0x118   : > { %v779_v48 = vadd.f32 %v2584_v4, %v778_v26 }
 0x11a   : > { %1454 = vrot.lane.b32.xlu2 %v779_v48, %s2192_s27  ;;  %v855_v15 = vmul.f32 %v832_v13, %v779_v48 }
 0x11f   : > { %1783 = vmatmul.msk.f32.gmra.mxu3 %vm489_vm0, %v851_v18  ;;  %v781_v31 = vpop.f32.mrf.mxu1 }
 0x120   : > { %v782_v45 = vadd.f32 %v2584_v4, %v781_v31 }
 0x122   : > { %1408 = vrot.lane.b32.xlu2 %v2607_v55, %s2193_s14  ;;  %1456 = vrot.lane.b32.xlu0 %v782_v45, %s2192_s27  ;;  %v856_v50 = vmul.f32 %v833_v43, %v782_v45 }
 0x127   : > { %1784 = vmatmul.msk.f32.gmra.mxu3 %vm489_vm0, %v852_v35  ;;  %v784_v46 = vpop.f32.mrf.mxu1 }
 0x128   : > { %v785_v29 = vadd.f32 %v2584_v4, %v784_v46 }
 0x12a   : > { %1458 = vrot.lane.b32.xlu1 %v785_v29, %s2192_s27  ;;  %v857_v4 = vmul.f32 %v833_v43, %v785_v29  ;;  %s1627_s27 = sshll.u32 %s471_s22, 4  ;;  %s1628_s27 = int_to_ptr.vmem [resolvable:$true] %s1627_s27 }
 0x12f   : > { %1785 = vmatmul.msk.f32.gmra.mxu3 %vm489_vm0, %v853_v36 }
 0x137   : > { %1786 = vmatmul.msk.f32.gmra.mxu3 %vm489_vm0, %v854_v37 }
 0x13f   : > { %1787 = vmatmul.msk.f32.gmra.mxu3 %vm489_vm0, %v855_v15 }
 0x147   : > { %1788 = vmatmul.msk.f32.gmra.mxu3 %vm489_vm0, %v856_v50 }
 0x14f   : > { %1789 = vmatmul.msk.f32.gmra.mxu3 %vm489_vm0, %v857_v4 }
 0x15b   : > { %v789_v62 = vpop.permute.xlu0 %788 }
 0x15c   : > { %v791_v47 = vmul.f32 %v789_v62, %v2607_v55 }
 0x15e   : > { %1773 = vmatmul.msk.f32.vlgmr.msra.gmra.mxu2 %vm489_vm0, %v791_v47 }
 0x170   : > { %v2678_v58 = vpop.f32.mrf.mxu0 }
 0x171   : > { %v972_v9 = vsel %vm971_vm9, %v2678_v58, -inf }
 0x172   : > { %v2664_v7 = vpop.f32.mrf.mxu3 }
 0x173   : > { %v982_v0 = vsel %vm971_vm9, %v2664_v7, -inf }
 0x178   : > { %v2682_v55 = vpop.f32.mrf.mxu0 }
 0x179   : > { %v973_v1 = vsel %vm971_vm9, %v2682_v55, -inf }
 0x17a   : > { %v2666_v51 = vpop.f32.mrf.mxu3  ;;  %v974_v11 = vmax.f32 %v972_v9, %v973_v1 }
 0x17b   : > { %v990_v12 = vsel %vm971_vm9, %v2666_v51, -inf }
 0x17c   : > { %v975_v3 = vrot.slane %v974_v11, 4 }
 0x17e   : > { %v976_v40 = vmax.f32 %v974_v11, %v975_v3 }
 0x180   : > { %v2686_v60 = vpop.f32.mrf.mxu0  ;;  %v977_v25 = vrot.slane %v976_v40, 2 }
 0x181   : > { %v981_v63 = vsel %vm971_vm9, %v2686_v60, -inf }
 0x182   : > { %v2668_v52 = vpop.f32.mrf.mxu3  ;;  %v983_v5 = vmax.f32 %v981_v63, %v982_v0  ;;  %v978_v37 = vmax.f32 %v976_v40, %v977_v25 }
 0x183   : > { %v991_v6 = vsel %vm971_vm9, %v2668_v52, -inf }
 0x184   : > { %v992_v16 = vmax.f32 %v990_v12, %v991_v6  ;;  %v984_v2 = vrot.slane %v983_v5, 4  ;;  %v979_v1 = vrot.slane %v978_v37, 1 }
 0x186   : > { %v993_v33 = vrot.slane %v992_v16, 4  ;;  %v985_v30 = vmax.f32 %v983_v5, %v984_v2 }
 0x188   : > { %v994_v26 = vmax.f32 %v992_v16, %v993_v33  ;;  %v986_v18 = vrot.slane %v985_v30, 2 }
 0x18a   : > { %v2670_v53 = vpop.f32.mrf.mxu3  ;;  %v995_v46 = vrot.slane %v994_v26, 2  ;;  %v987_v36 = vmax.f32 %v985_v30, %v986_v18 }
 0x18b   : > { %v999_v28 = vsel %vm971_vm9, %v2670_v53, -inf }
 0x18c   : > { %v996_v42 = vmax.f32 %v994_v26, %v995_v46  ;;  %v988_v50 = vrot.slane %v987_v36, 1 }
 0x18e   : > { %v997_v9 = vrot.slane %v996_v42, 1  ;;  %v989_v11 = vmax.f32 %v987_v36, %v988_v50 }
 0x192   : > { %v2672_v54 = vpop.f32.mrf.mxu3 }
 0x193   : > { %v1000_v10 = vsel %vm971_vm9, %v2672_v54, -inf }
 0x194   : > { %v1001_v19 = vmax.f32 %v999_v28, %v1000_v10  ;;  %v980_v28 = vmax.f32 %v978_v37, %v979_v1 }
 0x196   : > { %v1002_v38 = vrot.slane %v1001_v19, 4 }
 0x198   : > { %v1003_v44 = vmax.f32 %v1001_v19, %v1002_v38  ;;  %v998_v19 = vmax.f32 %v996_v42, %v997_v9 }
 0x19a   : > { %v2674_v56 = vpop.f32.mrf.mxu3  ;;  %v1004_v49 = vrot.slane %v1003_v44, 2 }
 0x19b   : > { %v1008_v20 = vsel %vm971_vm9, %v2674_v56, -inf }
 0x19c   : > { %v1005_v4 = vmax.f32 %v1003_v44, %v1004_v49 }
 0x19e   : > { %v1006_v12 = vrot.slane %v1005_v4, 1 }
 0x1a2   : > { %v2676_v57 = vpop.f32.mrf.mxu3 }
 0x1a3   : > { %v1009_v14 = vsel %vm971_vm9, %v2676_v57, -inf }
 0x1a4   : > { %v1010_v22 = vmax.f32 %v1008_v20, %v1009_v14 }
 0x1a6   : > { %v1011_v39 = vrot.slane %v1010_v22, 4 }
 0x1a8   : > { %v1012_v45 = vmax.f32 %v1010_v22, %v1011_v39  ;;  %v1052_v22 = vsel %vm624_vm2, %v989_v11, %v980_v28 }
 0x1a9   : > { %v1053_v33 = vsel %vm627_vm3, %v998_v19, %v1052_v22 }
 0x1aa   : > { %v2680_v8 = vpop.f32.mrf.mxu3  ;;  %v1013_v13 = vrot.slane %v1012_v45, 2 }
 0x1ab   : > { %v1017_v23 = vsel %vm971_vm9, %v2680_v8, -inf }
 0x1ac   : > { %v1014_v47 = vmax.f32 %v1012_v45, %v1013_v13 }
 0x1ae   : > { %v1015_v16 = vrot.slane %v1014_v47, 1 }
 0x1b0   : > { %v1016_v3 = vmax.f32 %v1014_v47, %v1015_v16 }
 0x1b2   : > { %v2684_v59 = vpop.f32.mrf.mxu3 }
 0x1b3   : > { %v1018_v17 = vsel %vm971_vm9, %v2684_v59, -inf }
 0x1b4   : > { %v1019_v27 = vmax.f32 %v1017_v23, %v1018_v17  ;;  %v1007_v23 = vmax.f32 %v1005_v4, %v1006_v12 }
 0x1b6   : > { %v1020_v41 = vrot.slane %v1019_v27, 4  ;;  %v1054_v38 = vsel %vm630_vm4, %v1007_v23, %v1053_v33 }
 0x1b7   : > { %v1055_v39 = vsel %vm633_vm5, %v1016_v3, %v1054_v38 }
 0x1b8   : > { %v1021_v35 = vmax.f32 %v1019_v27, %v1020_v41 }
 0x1ba   : > { %v2688_v61 = vpop.f32.mrf.mxu3  ;;  %v1022_v15 = vrot.slane %v1021_v35, 2 }
 0x1bb   : > { %v1026_v32 = vsel %vm971_vm9, %v2688_v61, -inf }
 0x1bc   : > { %v1023_v5 = vmax.f32 %v1021_v35, %v1022_v15 }
 0x1be   : > { %v1024_v17 = vrot.slane %v1023_v5, 1 }
 0x1c0   : > { %v1025_v27 = vmax.f32 %v1023_v5, %v1024_v17 }
 0x1c2   : > { %v2712_v21 = vpop.f32.mrf.mxu3  ;;  %v1056_v41 = vsel %vm636_vm6, %v1025_v27, %v1055_v39 }
 0x1c3   : > { %v1027_v24 = vsel %vm971_vm9, %v2712_v21, -inf }
 0x1c4   : > { %v1028_v34 = vmax.f32 %v1026_v32, %v1027_v24 }
 0x1c6   : > { %v1029_v48 = vrot.slane %v1028_v34, 4 }
 0x1c8   : > { %v1030_v29 = vmax.f32 %v1028_v34, %v1029_v48 }
 0x1ca   : > { %v2720_v31 = vpop.f32.mrf.mxu3  ;;  %v1031_v43 = vrot.slane %v1030_v29, 2 }
 0x1cb   : > { %v1035_v63 = vsel %vm971_vm9, %v2720_v31, -inf }
 0x1cc   : > { %v1032_v10 = vmax.f32 %v1030_v29, %v1031_v43 }
 0x1ce   : > { %v1033_v20 = vrot.slane %v1032_v10, 1 }
 0x1d0   : > { %v1034_v34 = vmax.f32 %v1032_v10, %v1033_v20 }
 0x1d2   : > { %v2722_v62 = vpop.f32.mrf.mxu3  ;;  %v1057_v48 = vsel %vm639_vm7, %v1034_v34, %v1056_v41 }
 0x1d3   : > { %v1036_v0 = vsel %vm971_vm9, %v2722_v62, -inf }
 0x1d4   : > { %v1037_v6 = vmax.f32 %v1035_v63, %v1036_v0 }
 0x1d6   : > { %v1038_v14 = vrot.slane %v1037_v6, 4 }
 0x1d8   : > { %v1039_v2 = vmax.f32 %v1037_v6, %v1038_v14 }
 0x1da   : > { %v1040_v24 = vrot.slane %v1039_v2, 2 }
 0x1dc   : > { %v1041_v32 = vmax.f32 %v1039_v2, %v1040_v24 }
 0x1de   : > { %v1042_v30 = vrot.slane %v1041_v32, 1 }
 0x1e0   : > { %v1043_v40 = vmax.f32 %v1041_v32, %v1042_v30 }
 0x1e1   : > { %v2733_v26 = vpop.f32.mrf.mxu2 }
 0x1e2   : > { %v1058_v18 = vsel %vm642_vm8, %v1043_v40, %v1057_v48 }
 0x1e3   : > { %v2738_v44 = vmax.f32 %v2733_v26, %v1058_v18 }
 0x1e5   : > { %v1065_v45 = vrot.slane %v2738_v44, 1  ;;  %v1066_v25 = vrot.slane %v2738_v44, 2  ;;  %v1067_v35 = vrot.slane %v2738_v44, 3  ;;  %v1068_v46 = vrot.slane %v2738_v44, 4 }
 0x1e6   : > { %v1072_v29 = vperm.slane %v2738_v44, 0  ;;  %v1069_v13 = vrot.slane %v2738_v44, 5  ;;  %v1070_v4 = vrot.slane %v2738_v44, 6  ;;  %v1071_v0 = vrot.slane %v2738_v44, 7 }
 0x1e7   : > { %v1073_v36 = vperm.slane %v1065_v45, 0  ;;  %v1074_v49 = vperm.slane %v1066_v25, 0  ;;  %v1075_v37 = vperm.slane %v1067_v35, 0  ;;  %v1076_v47 = vperm.slane %v1068_v46, 0 }
 0x1e8   : > { %v1088_v15 = vsub.f32 %v2678_v58, %v1072_v29  ;;  %v1089_v42 = vsub.f32 %v2682_v55, %v1072_v29  ;;  %v1077_v5 = vperm.slane %v1069_v13, 0  ;;  %v1078_v11 = vperm.slane %v1070_v4, 0 }
 0x1e9   : > { %v1090_v43 = vsub.f32 %v2686_v60, %v1073_v36  ;;  %v1091_v50 = vsub.f32 %v2664_v7, %v1073_v36  ;;  %v1092_v63 = vsub.f32 %v2666_v51, %v1074_v49  ;;  %v1093_v1 = vsub.f32 %v2668_v52, %v1074_v49 }
 0x1ea   : > { %v1094_v6 = vsub.f32 %v2670_v53, %v1075_v37  ;;  %v1104_v9 = vmul.f32 1.442695, %v1088_v15  ;;  %v1106_v58 = vmul.f32 1.442695, %v1089_v42  ;;  %v1095_v55 = vsub.f32 %v2672_v54, %v1075_v37 }
 0x1eb   : > { %v1108_v10 = vmul.f32 1.442695, %v1090_v43  ;;  %v1110_v60 = vmul.f32 1.442695, %v1091_v50  ;;  %v1096_v7 = vsub.f32 %v2674_v56, %v1076_v47  ;;  %v1112_v12 = vmul.f32 1.442695, %v1092_v63 }
 0x1ec   : > { %1923 = vpow2.f32 %v1104_v9  ;;  %v1097_v51 = vsub.f32 %v2676_v57, %v1076_v47  ;;  %v1114_v14 = vmul.f32 1.442695, %v1093_v1  ;;  %v1079_v16 = vperm.slane %v1071_v0, 0  ;;  %v1267_v0 = vld [vmem:[%s2947_s10] sm:$0xf] }
 0x1ed   : > { %1925 = vpow2.f32 %v1106_v58  ;;  %v1098_v52 = vsub.f32 %v2680_v8, %v1077_v5  ;;  %v1116_v53 = vmul.f32 1.442695, %v1094_v6  ;;  %v1099_v28 = vsub.f32 %v2684_v59, %v1077_v5  ;;  %1824 = vmatpush.msk.msrb.mxu2 %vm1271_vm10, %v1267_v0  ;;  %1790 = vmatpush.msk.msrb.mxu0 %vm1271_vm10, %v1267_v0 }
 0x1ee   : > { %1927 = vpow2.f32 %v1108_v10  ;;  %v1118_v54 = vmul.f32 1.442695, %v1095_v55  ;;  %v1100_v17 = vsub.f32 %v2688_v61, %v1078_v11  ;;  %v1120_v2 = vmul.f32 1.442695, %v1096_v7 }
 0x1ef   : > { %1929 = vpow2.f32 %v1110_v60  ;;  %v1101_v56 = vsub.f32 %v2712_v21, %v1078_v11  ;;  %v1122_v19 = vmul.f32 1.442695, %v1097_v51  ;;  %v1102_v20 = vsub.f32 %v2720_v31, %v1079_v16  ;;  %1792 = vmatpush.msk.msra.mxu0 %vm1271_vm10, %v1267_v0 }
 0x1f0   : > { %1931 = vpow2.f32 %v1112_v12  ;;  %v1103_v8 = vsub.f32 %v2722_v62, %v1079_v16  ;;  %v1124_v22 = vmul.f32 1.442695, %v1098_v52  ;;  %v1126_v59 = vmul.f32 1.442695, %v1099_v28 }
 0x1f1   : > { %1933 = vpow2.f32 %v1114_v14  ;;  %v1128_v21 = vmul.f32 1.442695, %v1100_v17  ;;  %v1130_v31 = vmul.f32 1.442695, %v1101_v56  ;;  %v1132_v34 = vmul.f32 1.442695, %v1102_v20 }
 0x1f2   : > { %v2762_v57 = vpop.eup %1923  ;;  %1935 = vpow2.f32 %v1116_v53  ;;  %v1134_v30 = vmul.f32 1.442695, %v1103_v8  ;;  %v1061_v10 = vsub.f32 %v2733_v26, %v2738_v44 }
 0x1f3   : > { %v2766_v23 = vpop.eup %1925  ;;  %1937 = vpow2.f32 %v1118_v54  ;;  %v1136_v61 = vsel %vm971_vm9, %v2762_v57, 0.0 }
 0x1f4   : > { %v2770_v24 = vpop.eup %1927  ;;  %1939 = vpow2.f32 %v1120_v2  ;;  %v1137_v3 = vsel %vm971_vm9, %v2766_v23, 0.0 }
 0x1f5   : > { %v2774_v27 = vpop.eup %1929  ;;  %1941 = vpow2.f32 %v1122_v19  ;;  %v1138_v62 = vadd.f32 %v1137_v3, %v1136_v61  ;;  %v1145_v32 = vsel %vm971_vm9, %v2770_v24, 0.0 }
 0x1f6   : > { %v2778_v33 = vpop.eup %1931  ;;  %1943 = vpow2.f32 %v1124_v22  ;;  %v1146_v38 = vsel %vm971_vm9, %v2774_v27, 0.0 }
 0x1f7   : > { %v2782_v39 = vpop.eup %1933  ;;  %1945 = vpow2.f32 %v1126_v59  ;;  %v1139_v40 = vrot.slane %v1138_v62, 4  ;;  %v1147_v41 = vadd.f32 %v1146_v38, %v1145_v32  ;;  %v1154_v48 = vsel %vm971_vm9, %v2778_v33, 0.0 }
 0x1f8   : > { %v2786_v18 = vpop.eup %1935  ;;  %1947 = vpow2.f32 %v1128_v21  ;;  %v1155_v45 = vsel %vm971_vm9, %v2782_v39, 0.0 }
 0x1f9   : > { %v2790_v25 = vpop.eup %1937  ;;  %1949 = vpow2.f32 %v1130_v31  ;;  %v1140_v35 = vadd.f32 %v1139_v40, %v1138_v62  ;;  %v1148_v46 = vrot.slane %v1147_v41, 4  ;;  %v1156_v29 = vadd.f32 %v1155_v45, %v1154_v48 }
 0x1fa   : > { %v2792_v36 = vpop.eup %1939  ;;  %1951 = vpow2.f32 %v1132_v34  ;;  %v1163_v49 = vsel %vm971_vm9, %v2786_v18, 0.0  ;;  %v1164_v13 = vsel %vm971_vm9, %v2790_v25, 0.0 }
 0x1fb   : > { %v2798_v37 = vpop.eup %1941  ;;  %1953 = vpow2.f32 %v1134_v30  ;;  %v1141_v15 = vrot.slane %v1140_v35, 2  ;;  %v1149_v42 = vadd.f32 %v1148_v46, %v1147_v41  ;;  %v1157_v43 = vrot.slane %v1156_v29, 4 }
 0x1fc   : > { %v2800_v50 = vpop.eup %1943  ;;  %v1165_v4 = vadd.f32 %v1164_v13, %v1163_v49  ;;  %v1172_v47 = vsel %vm971_vm9, %v2792_v36, 0.0  ;;  %v1173_v63 = vsel %vm971_vm9, %v2798_v37, 0.0  ;;  %v1062_v49 = vmul.f32 1.442695, %v1061_v10 }
 0x1fd   : > { %v2809_v1 = vpop.eup %1945  ;;  %v1142_v5 = vadd.f32 %v1141_v15, %v1140_v35  ;;  %v1150_v6 = vrot.slane %v1149_v42, 2  ;;  %v1158_v9 = vadd.f32 %v1157_v43, %v1156_v29  ;;  %v1174_v58 = vadd.f32 %v1173_v63, %v1172_v47 }
 0x1fe   : > { %v2811_v55 = vpop.eup %1947  ;;  %v1166_v60 = vrot.slane %v1165_v4, 4  ;;  %v1181_v11 = vsel %vm971_vm9, %v2800_v50, 0.0  ;;  %v1182_v7 = vsel %vm971_vm9, %v2809_v1, 0.0  ;;  %1955 = vpow2.f32 %v1062_v49 }
 0x1ff   : > { %v2819_v12 = vpop.eup %1949  ;;  %v1143_v51 = vrot.slane %v1142_v5, 1  ;;  %v1151_v14 = vadd.f32 %v1150_v6, %v1149_v42  ;;  %v1159_v16 = vrot.slane %v1158_v9, 2  ;;  %v1175_v52 = vrot.slane %v1174_v58, 4 }
 0x200   : > { %v2821_v53 = vpop.eup %1951  ;;  %v1167_v28 = vadd.f32 %v1166_v60, %v1165_v4  ;;  %v1183_v54 = vadd.f32 %v1182_v7, %v1181_v11  ;;  %v1190_v26 = vsel %vm971_vm9, %v2811_v55, 0.0  ;;  %v1191_v44 = vsel %vm971_vm9, %v2819_v12, 0.0 }
 0x201   : > { %v2827_v17 = vpop.eup %1953  ;;  %v1144_v2 = vadd.f32 %v1143_v51, %v1142_v5  ;;  %v1152_v56 = vrot.slane %v1151_v14, 1  ;;  %v1160_v19 = vadd.f32 %v1159_v16, %v1158_v9  ;;  %v1176_v20 = vadd.f32 %v1175_v52, %v1174_v58 }
 0x202   : > { %v1168_v8 = vrot.slane %v1167_v28, 2  ;;  %v1184_v22 = vrot.slane %v1183_v54, 4  ;;  %v1192_v59 = vadd.f32 %v1191_v44, %v1190_v26  ;;  %v1199_v61 = vsel %vm971_vm9, %v2821_v53, 0.0 }
 0x203   : > { %v1153_v21 = vadd.f32 %v1152_v56, %v1151_v14  ;;  %v1161_v3 = vrot.slane %v1160_v19, 1  ;;  %v1177_v31 = vrot.slane %v1176_v20, 2  ;;  %v1200_v62 = vsel %vm971_vm9, %v2827_v17, 0.0 }
 0x204   : > { %v1169_v32 = vadd.f32 %v1168_v8, %v1167_v28  ;;  %v1185_v34 = vadd.f32 %v1184_v22, %v1183_v54  ;;  %v1193_v30 = vrot.slane %v1192_v59, 4  ;;  %v1201_v38 = vadd.f32 %v1200_v62, %v1199_v61  ;;  %v1956_v28 = vpop.eup %1955 }
 0x205   : > { %v1162_v40 = vadd.f32 %v1161_v3, %v1160_v19  ;;  %v1178_v41 = vadd.f32 %v1177_v31, %v1176_v20  ;;  %v1216_v48 = vsel %vm624_vm2, %v1153_v21, %v1144_v2 }
 0x206   : > { %v1170_v45 = vrot.slane %v1169_v32, 1  ;;  %v1186_v35 = vrot.slane %v1185_v34, 2  ;;  %v1194_v46 = vadd.f32 %v1193_v30, %v1192_v59  ;;  %v1202_v29 = vrot.slane %v1201_v38, 4 }
 0x207   : > { %v1179_v13 = vrot.slane %v1178_v41, 1  ;;  %v1217_v15 = vsel %vm627_vm3, %v1162_v40, %v1216_v48 }
 0x208   : > { %v1171_v42 = vadd.f32 %v1170_v45, %v1169_v32  ;;  %v1187_v43 = vadd.f32 %v1186_v35, %v1185_v34  ;;  %v1195_v4 = vrot.slane %v1194_v46, 2  ;;  %v1203_v47 = vadd.f32 %v1202_v29, %v1201_v38 }
 0x209   : > { %v1180_v63 = vadd.f32 %v1179_v13, %v1178_v41 }
 0x20a   : > { %v1188_v0 = vrot.slane %v1187_v43, 1  ;;  %v1196_v5 = vadd.f32 %v1195_v4, %v1194_v46  ;;  %v1204_v6 = vrot.slane %v1203_v47, 2  ;;  %v1218_v9 = vsel %vm630_vm4, %v1171_v42, %v1217_v15 }
 0x20b   : > { %v1219_v58 = vsel %vm633_vm5, %v1180_v63, %v1218_v9 }
 0x20c   : > { %v1189_v60 = vadd.f32 %v1188_v0, %v1187_v43  ;;  %v1197_v11 = vrot.slane %v1196_v5, 1  ;;  %v1205_v7 = vadd.f32 %v1204_v6, %v1203_v47 }
 0x20e   : > { %v1198_v10 = vadd.f32 %v1197_v11, %v1196_v5  ;;  %v1206_v51 = vrot.slane %v1205_v7, 1  ;;  %v1220_v14 = vsel %vm636_vm6, %v1189_v60, %v1219_v58 }
 0x210   : > { %v1207_v16 = vadd.f32 %v1206_v51, %v1205_v7  ;;  %v1221_v52 = vsel %vm639_vm7, %v1198_v10, %v1220_v14 }
 0x212   : > { %v1222_v54 = vsel %vm642_vm8, %v1207_v16, %v1221_v52 }
 0x213   : > { %v1224_v26 = vadd.f32 %v1956_v28, %v1222_v54 }
 0x215   : > { %1957 = vrcp.f32 %v1224_v26 }
 0x21b   : > { %v1958_v44 = vpop.eup %1957 }
 0x21c   : > { %v1226_v2 = vmul.f32 %v1958_v44, %v1956_v28  ;;  %v1229_v56 = vrot.slane %v1958_v44, 2  ;;  %v1228_v19 = vrot.slane %v1958_v44, 1  ;;  %v1231_v20 = vrot.slane %v1958_v44, 4 }
 0x21d   : > { %v1232_v8 = vrot.slane %v1958_v44, 5  ;;  %v1233_v22 = vrot.slane %v1958_v44, 6  ;;  %v1235_v32 = vperm.slane %v1958_v44, 0  ;;  %v1234_v35 = vrot.slane %v1958_v44, 7 }
 0x21e   : > { %1791 = vmatmul.msk.f32.vlgmr.msrb.gmra.mxu0 %vm971_vm9, %v1226_v2  ;;  %v1237_v59 = vperm.slane %v1229_v56, 0  ;;  %v1236_v61 = vperm.slane %v1228_v19, 0  ;;  %v1239_v21 = vperm.slane %v1231_v20, 0  ;;  %v1230_v29 = vrot.slane %v1958_v44, 3 }
 0x21f   : > { %v1240_v3 = vperm.slane %v1232_v8, 0  ;;  %v1241_v31 = vperm.slane %v1233_v22, 0  ;;  %v1242_v46 = vperm.slane %v1234_v35, 0 }
 0x220   : > { %v1255_v62 = vmul.f32 %v2778_v33, %v1237_v59  ;;  %v1254_v34 = vmul.f32 %v2774_v27, %v1236_v61  ;;  %v1259_v30 = vmul.f32 %v2792_v36, %v1239_v21  ;;  %v1260_v38 = vmul.f32 %v2798_v37, %v1239_v21 }
 0x221   : > { %v1261_v40 = vmul.f32 %v2800_v50, %v1240_v3  ;;  %v1262_v41 = vmul.f32 %v2809_v1, %v1240_v3  ;;  %v1263_v48 = vmul.f32 %v2811_v55, %v1241_v31  ;;  %v1264_v45 = vmul.f32 %v2819_v12, %v1241_v31 }
 0x222   : > { %1797 = vmatmul.msk.f32.vlgmr.msrb.gmra.mxu2 %vm971_vm9, %v1255_v62  ;;  %v1251_v33 = vmul.f32 %v2762_v57, %v1235_v32  ;;  %v1265_v27 = vmul.f32 %v2821_v53, %v1242_v46  ;;  %v1266_v36 = vmul.f32 %v2827_v17, %v1242_v46  ;;  %v1256_v37 = vmul.f32 %v2782_v39, %v1237_v59  ;;  %v1441_v39 = vpop.permute.xlu1 %1440 }
 0x223   : > { %v1252_v50 = vmul.f32 %v2766_v23, %v1235_v32  ;;  %v1238_v1 = vperm.slane %v1230_v29, 0  ;;  %v1253_v57 = vmul.f32 %v2770_v24, %v1236_v61  ;;  %v1435_v24 = vpop.permute.xlu2 %1434 }
 0x225   : > { %v1257_v55 = vmul.f32 %v2786_v18, %v1238_v1  ;;  %v1258_v12 = vmul.f32 %v2790_v25, %v1238_v1  ;;  %v1439_v25 = vpop.permute.xlu0 %1438 }
 0x226   : > { %1793 = vmatmul.msk.f32.vlgmr.msra.gmra.mxu0 %vm971_vm9, %v1251_v33 }
 0x22a   : > { %1798 = vmatmul.msk.f32.gmra.mxu2 %vm971_vm9, %v1256_v37  ;;  %v1431_v49 = vpop.permute.xlu1 %1430 }
 0x22b   : > { %v1437_v17 = vpop.permute.xlu2 %1436 }
 0x22d   : > { %v1429_v43 = vpop.permute.xlu0 %1428 }
 0x22e   : > { %1794 = vmatmul.msk.f32.gmra.mxu0 %vm971_vm9, %v1252_v50 }
 0x232   : > { %1799 = vmatmul.msk.f32.gmra.mxu2 %vm971_vm9, %v1257_v55  ;;  %v1433_v14 = vpop.permute.xlu1 %1432 }
 0x233   : > { %v1443_v2 = vpop.permute.xlu2 %1442 }
 0x236   : > { %1795 = vmatmul.msk.f32.gmra.mxu0 %vm971_vm9, %v1253_v57 }
 0x23a   : > { %1800 = vmatmul.msk.f32.gmra.mxu2 %vm971_vm9, %v1258_v12 }
 0x23e   : > { %1796 = vmatmul.msk.f32.gmra.mxu0 %vm971_vm9, %v1254_v34 }
 0x242   : > { %1801 = vmatmul.msk.f32.gmra.mxu2 %vm971_vm9, %v1259_v30 }
 0x24a   : > { %1802 = vmatmul.msk.f32.gmra.mxu2 %vm971_vm9, %v1260_v38 }
 0x252   : > { %1803 = vmatmul.msk.f32.gmra.mxu2 %vm971_vm9, %v1261_v40 }
 0x25a   : > { %1804 = vmatmul.msk.f32.gmra.mxu2 %vm971_vm9, %v1262_v41 }
 0x262   : > { %1805 = vmatmul.msk.f32.gmra.mxu2 %vm971_vm9, %v1263_v48 }
 0x26a   : > { %1806 = vmatmul.msk.f32.gmra.mxu2 %vm971_vm9, %v1264_v45 }
 0x272   : > { %1807 = vmatmul.msk.f32.gmra.mxu2 %vm971_vm9, %v1265_v27 }
 0x27a   : > { %1808 = vmatmul.msk.f32.gmra.mxu2 %vm971_vm9, %v1266_v36 }
 0x29b   : > { %v2873_v23 = vpop.f32.mrf.mxu0 }
 0x2a3   : > { %v1360_v18 = vpop.f32.mrf.mxu0 }
 0x2a4   : > { %v1476_v47 = vmul.f32 %v1429_v43, %v1360_v18 }
 0x2a5   : > { %v1372_v53 = vpop.f32.mrf.mxu2 }
 0x2a6   : > { %v1480_v15 = vmul.f32 %v1437_v17, %v1372_v53  ;;  %v1492_v58 = vsel %vm489_vm0, %v1476_v47, 0.0  ;;  %v1584_v53 = vld [vmem:[#allocation8 + $0x18] sm:$0xff]  ;;  %v1583_v17 = vld [vmem:[#allocation8 + $0x10] sm:$0xff] }
 0x2a7   : > { %1604 = vmatpush.msrb.mxu0 %v1584_v53 }
 0x2a8   : > { %v1510_v0 = vsel %vm489_vm0, %v1480_v15, 0.0  ;;  %v1447_v15 = vpop.permute.xlu1 %1446 }
 0x2a9   : > { %1605 = vmatpush.msrb.mxu0 %v1583_v17 }
 0x2ab   : > { %v1363_v13 = vpop.f32.mrf.mxu0 }
 0x2ac   : > { %v1477_v42 = vmul.f32 %v1431_v49, %v1363_v13  ;;  %v1445_v49 = vpop.permute.xlu0 %1444  ;;  %v1449_v13 = vpop.permute.xlu2 %1448 }
 0x2ad   : > { %v1375_v4 = vpop.f32.mrf.mxu2 }
 0x2ae   : > { %v1481_v63 = vmul.f32 %v1439_v25, %v1375_v4  ;;  %v1493_v5 = vsel %vm489_vm0, %v1477_v42, 0.0 }
 0x2af   : > { %v1494_v60 = vadd.f32 %v1493_v5, %v1492_v58 }
 0x2b0   : > { %v1511_v6 = vsel %vm489_vm0, %v1481_v63, 0.0 }
 0x2b1   : > { %v1512_v9 = vadd.f32 %v1511_v6, %v1510_v0  ;;  %v1495_v10 = vrot.slane %v1494_v60, 4  ;;  %v1453_v0 = vpop.permute.xlu1 %1452 }
 0x2b3   : > { %v1366_v11 = vpop.f32.mrf.mxu0  ;;  %v1513_v51 = vrot.slane %v1512_v9, 4  ;;  %v1496_v52 = vadd.f32 %v1495_v10, %v1494_v60 }
 0x2b4   : > { %v1478_v16 = vmul.f32 %v1433_v14, %v1366_v11  ;;  %v1451_v43 = vpop.permute.xlu0 %1450  ;;  %v1455_v6 = vpop.permute.xlu2 %1454  ;;  %v1582_v11 = vld [vmem:[#allocation8 + $0x8] sm:$0xff] }
 0x2b5   : > { %v1378_v7 = vpop.f32.mrf.mxu2  ;;  %v1514_v54 = vadd.f32 %v1513_v51, %v1512_v9  ;;  %v1497_v22 = vrot.slane %v1496_v52, 2  ;;  %1606 = vmatpush.msrb.mxu0 %v1582_v11 }
 0x2b6   : > { %v1482_v26 = vmul.f32 %v1441_v39, %v1378_v7  ;;  %v1501_v19 = vsel %vm489_vm0, %v1478_v16, 0.0  ;;  %v1581_v7 = vld [vmem:[#allocation8] sm:$0xff] }
 0x2b7   : > { %v1515_v61 = vrot.slane %v1514_v54, 2  ;;  %v1498_v32 = vadd.f32 %v1497_v22, %v1496_v52  ;;  %1607 = vmatpush.msrb.mxu0 %v1581_v7 }
 0x2b8   : > { %v1519_v21 = vsel %vm489_vm0, %v1482_v26, 0.0 }
 0x2b9   : > { %v1516_v38 = vadd.f32 %v1515_v61, %v1514_v54  ;;  %v1499_v45 = vrot.slane %v1498_v32, 1 }
 0x2bb   : > { %v1369_v28 = vpop.f32.mrf.mxu0  ;;  %v1517_v46 = vrot.slane %v1516_v38, 1  ;;  %v1500_v37 = vadd.f32 %v1499_v45, %v1498_v32 }
 0x2bc   : > { %v1479_v44 = vmul.f32 %v1435_v24, %v1369_v28  ;;  %v1457_v61 = vpop.permute.xlu0 %1456 }
 0x2bd   : > { %v1381_v56 = vpop.f32.mrf.mxu2  ;;  %v1518_v1 = vadd.f32 %v1517_v46, %v1516_v38 }
 0x2be   : > { %v1502_v20 = vsel %vm489_vm0, %v1479_v44, 0.0  ;;  %v1483_v8 = vmul.f32 %v1443_v2, %v1381_v56 }
 0x2bf   : > { %v1503_v59 = vadd.f32 %v1502_v20, %v1501_v19 }
 0x2c0   : > { %v1520_v3 = vsel %vm489_vm0, %v1483_v8, 0.0 }
 0x2c1   : > { %v1504_v31 = vrot.slane %v1503_v59, 4  ;;  %v1521_v62 = vadd.f32 %v1520_v3, %v1519_v21 }
 0x2c3   : > { %v1505_v34 = vadd.f32 %v1504_v31, %v1503_v59  ;;  %v1522_v30 = vrot.slane %v1521_v62, 4  ;;  %v1459_v31 = vpop.permute.xlu1 %1458 }
 0x2c5   : > { %v1506_v40 = vrot.slane %v1505_v34, 2  ;;  %v1523_v41 = vadd.f32 %v1522_v30, %v1521_v62  ;;  %v1384_v48 = vpop.f32.mrf.mxu2 }
 0x2c6   : > { %v1484_v63 = vmul.f32 %v1445_v49, %v1384_v48 }
 0x2c7   : > { %v1507_v35 = vadd.f32 %v1506_v40, %v1505_v34  ;;  %v1524_v33 = vrot.slane %v1523_v41, 2 }
 0x2c8   : > { %v1528_v14 = vsel %vm489_vm0, %v1484_v63, 0.0 }
 0x2c9   : > { %v1508_v27 = vrot.slane %v1507_v35, 1  ;;  %v1525_v36 = vadd.f32 %v1524_v33, %v1523_v41 }
 0x2cb   : > { %v1509_v29 = vadd.f32 %v1508_v27, %v1507_v35  ;;  %v1526_v50 = vrot.slane %v1525_v36, 1 }
 0x2cd   : > { %v1572_v55 = vsel %vm624_vm2, %v1509_v29, %v1500_v37  ;;  %v1527_v57 = vadd.f32 %v1526_v50, %v1525_v36  ;;  %v1387_v12 = vpop.f32.mrf.mxu2 }
 0x2ce   : > { %v1573_v24 = vsel %vm627_vm3, %v1518_v1, %v1572_v55  ;;  %v1485_v4 = vmul.f32 %v1447_v15, %v1387_v12 }
 0x2cf   : > { %v2886_v39 = vsel %vm630_vm4, %v1527_v57, %v1573_v24 }
 0x2d0   : > { %v1529_v9 = vsel %vm489_vm0, %v1485_v4, 0.0 }
 0x2d1   : > { %v1530_v16 = vadd.f32 %v1529_v9, %v1528_v14 }
 0x2d3   : > { %v1531_v2 = vrot.slane %v1530_v16, 4 }
 0x2d5   : > { %v1390_v18 = vpop.f32.mrf.mxu2  ;;  %v1532_v8 = vadd.f32 %v1531_v2, %v1530_v16 }
 0x2d6   : > { %v1486_v5 = vmul.f32 %v1449_v13, %v1390_v18  ;;  %v1409_v18 = vpop.permute.xlu2 %1408 }
 0x2d7   : > { %v1533_v21 = vrot.slane %v1532_v8, 2  ;;  %v1411_v17 = vmul.f32 %v1409_v18, %v2873_v23 }
 0x2d8   : > { %v1537_v52 = vsel %vm489_vm0, %v1486_v5, 0.0 }
 0x2d9   : > { %v1534_v38 = vadd.f32 %v1533_v21, %v1532_v8 }
 0x2db   : > { %v1535_v46 = vrot.slane %v1534_v38, 1 }
 0x2dd   : > { %v1393_v25 = vpop.f32.mrf.mxu2  ;;  %v1536_v50 = vadd.f32 %v1535_v46, %v1534_v38 }
 0x2de   : > { %v1487_v47 = vmul.f32 %v1451_v43, %v1393_v25 }
 0x2df   : > { %v1575_v24 = vsel %vm633_vm5, %v1536_v50, %v2886_v39  ;;  %v1920_v39 = vld [vmem:[#allocation10] ss:$0 sm:$0xff] }
 0x2e0   : > { %v1538_v10 = vsel %vm489_vm0, %v1487_v47, 0.0 }
 0x2e1   : > { %v1539_v54 = vadd.f32 %v1538_v10, %v1537_v52 }
 0x2e3   : > { %v1540_v56 = vrot.slane %v1539_v54, 4 }
 0x2e5   : > { %v1396_v42 = vpop.f32.mrf.mxu2  ;;  %v1541_v22 = vadd.f32 %v1540_v56, %v1539_v54 }
 0x2e6   : > { %v1488_v58 = vmul.f32 %v1453_v0, %v1396_v42 }
 0x2e7   : > { %v1542_v62 = vrot.slane %v1541_v22, 2 }
 0x2e8   : > { %v1546_v26 = vsel %vm489_vm0, %v1488_v58, 0.0 }
 0x2e9   : > { %v1543_v48 = vadd.f32 %v1542_v62, %v1541_v22 }
 0x2eb   : > { %v1544_v27 = vrot.slane %v1543_v48, 1 }
 0x2ed   : > { %v1399_v60 = vpop.f32.mrf.mxu2  ;;  %v1545_v1 = vadd.f32 %v1544_v27, %v1543_v48 }
 0x2ee   : > { %v1489_v51 = vmul.f32 %v1455_v6, %v1399_v60 }
 0x2ef   : > { %v1576_v25 = vsel %vm636_vm6, %v1545_v1, %v1575_v24 }
 0x2f0   : > { %v1547_v28 = vsel %vm489_vm0, %v1489_v51, 0.0 }
 0x2f1   : > { %v1548_v44 = vadd.f32 %v1547_v28, %v1546_v26 }
 0x2f3   : > { %v1549_v20 = vrot.slane %v1548_v44, 4 }
 0x2f5   : > { %v1402_v19 = vpop.f32.mrf.mxu2  ;;  %v1550_v59 = vadd.f32 %v1549_v20, %v1548_v44 }
 0x2f6   : > { %v1490_v3 = vmul.f32 %v1457_v61, %v1402_v19 }
 0x2f7   : > { %v1551_v34 = vrot.slane %v1550_v59, 2 }
 0x2f8   : > { %v1555_v40 = vsel %vm489_vm0, %v1490_v3, 0.0 }
 0x2f9   : > { %v1552_v35 = vadd.f32 %v1551_v34, %v1550_v59 }
 0x2fb   : > { %v1553_v37 = vrot.slane %v1552_v35, 1 }
 0x2fd   : > { %v1405_v32 = vpop.f32.mrf.mxu2  ;;  %v1554_v57 = vadd.f32 %v1553_v37, %v1552_v35 }
 0x2fe   : > { %v1491_v30 = vmul.f32 %v1459_v31, %v1405_v32 }
 0x2ff   : > { %v1577_v49 = vsel %vm639_vm7, %v1554_v57, %v1576_v25 }
 0x300   : > { %v1556_v41 = vsel %vm489_vm0, %v1491_v30, 0.0 }
 0x301   : > { %v1557_v45 = vadd.f32 %v1556_v41, %v1555_v40 }
 0x303   : > { %v1558_v33 = vrot.slane %v1557_v45, 4 }
 0x305   : > { %v1559_v36 = vadd.f32 %v1558_v33, %v1557_v45 }
 0x307   : > { %v1560_v29 = vrot.slane %v1559_v36, 2 }
 0x309   : > { %v1561_v55 = vadd.f32 %v1560_v29, %v1559_v36 }
 0x30b   : > { %v1562_v12 = vrot.slane %v1561_v55, 1 }
 0x30d   : > { %v1563_v53 = vadd.f32 %v1562_v12, %v1561_v55 }
 0x30f   : > { %v1578_v13 = vsel %vm642_vm8, %v1563_v53, %v1577_v49 }
 0x310   : > { %v1580_v15 = vadd.f32 %v1578_v13, %v1411_v17 }
 0x312   : > { %1809 = vmatmul.msk.f32.vlgmr.msrb.gmra.mxu0 %vm489_vm0, %v1580_v15 }
 0x38f   : > { %v1609_v23 = vpop.f32.mrf.mxu0 }
 0x390   : > { %v1610_v42 = vadd.f32 %v1920_v39, %v1609_v23 }
 0x392   : > { %1613 = vst.msk [vmem:[%s471_s22] sm:$0xff] %vm1612_vm11, %v1610_v42 }
 0x393   : > { %2136 = shalt.err (!%p2133_p10)
}
 0x394   : > { %1843 = dma.vmem_to_hbm [thread:$0]  (%p2347_p3), %s1628_s27, 128, %s1630_s29, %s1615_s16  }
 0x395 PF: > { %s1641_s12 = sand.u32 1, %s2171_s17   ;;  %p2970_p12 = scmp.ge.s32.totalorder %s2183_s20, 2 }
 0x396   : > { %s1642_s5 = scalar_lea.sflag [#allocation4], %s1641_s12 }
 0x397   : > { %p1863_p13 = pnand %p2970_p12, %p2289_p6 }
 0x399   : > { %p1864_p0 = pneg %p1863_p13 }
 0x39b   : > { %2166 = dma.done.wait (%p1864_p0), %s1642_s5, 128  }
 0x39c   : > { %2168 = vsyncadd (%p1864_p0), %s1642_s5, 4294967168  ;;  %p26_p5 = scmp.ge.s32.totalorder %s2337_s26, 4   ;;  %s2971_s17 = smov %s2175_s18 }
 0x39d   : > { %s2972_s18 = smov %s2179_s19  ;;  %s2973_s19 = smov %s2353_s24 }
 0x39e   : > { %s2974_s20 = smov %s2337_s26  ;;  %28 = sbr.rel (!%p26_p5) target bundleno = 12 (0xc), region = 125 }
 0x3a3   :  { %1648 = vsyncpa [#allocation3], 1 }
 0x3a4   :  { %1650 = vsyncpa [#allocation3 + $0x1], 1 }
 0x3a5   :  { %1651 = vsyncpa [#allocation6], 1 }
 0x3a6   :  { %1652 = vsyncpa [#allocation9], 1 }
 0x3a7   :  { %1653 = vsyncpa [#allocation4], 1 }
 0x3a8   :  { %1655 = vsyncpa [#allocation4 + $0x1], 1 }

</bundles_post_ra>
